<compile_context>
chip_gen: v7x
topology: tpu7x:2x2x1
jax: 0.10.0
libtpu: 0.0.40
codegen_flags: <defaults>
</compile_context>

<pallas_src>
import functools

import jax
import jax.numpy as jnp
from jax import lax
from jax.experimental import pallas as pl
from jax.experimental.pallas import tpu as pltpu


def _round_up(x, m):
    return ((x + m - 1) // m) * m


def _gru_chunk_kernel(emb_ref, wih_ref, whh_ref, gib_ref, bhn_ref,
                      out_ref, hid_ref, h_scratch, gi_scratch,
                      *, t_chunk, bp, hp, seq_len):
    """One chunk of T_CHUNK GRU steps per grid iteration (PyTorch nn.GRU, h0=0).

    emb_ref   : (T_CHUNK*Bp, Hp)  bf16 time-major embedded inputs for this chunk
    wih_ref   : (Hp, 3Hp)         bf16 W_ih^T, per-gate packed [r|z|n], resident
    whh_ref   : (Hp, 3Hp)         bf16 W_hh^T, per-gate packed [r|z|n], resident
    gib_ref   : (1, 3Hp)          f32 folded bias (b_ih all gates + b_hh for r,z)
    bhn_ref   : (Bp, Hp)          f32 b_hn pre-broadcast (stays inside r*(...))
    out_ref   : (T_CHUNK*Bp, Hp)  f32 h_t for every step of this chunk
    hid_ref   : (Bp, Hp)          f32 final hidden state (written on last chunk)
    h_scratch : (Bp, Hp)          f32 VMEM carry of h across chunk boundaries
    gi_scratch: (T_CHUNK*Bp, 3Hp) f32 chunk-level input projection buffer
    """
    c = pl.program_id(0)

    @pl.when(c == 0)
    def _init():
        h_scratch[...] = jnp.zeros_like(h_scratch)

    # ---- Chunk-level input projection: one MXU-filling matmul (M = T_CHUNK*Bp)
    gi_scratch[...] = (
        jnp.dot(emb_ref[...], wih_ref[...], preferred_element_type=jnp.float32)
        + gib_ref[...])

    # Hoisted out of the serial loop (JAX does not CSE broadcasts).
    bhn = bhn_ref[...]                                          # (Bp, Hp) f32
    whh = whh_ref[...]                                          # (Hp, 3Hp) bf16
    h0 = h_scratch[...]                                         # (Bp, Hp) f32

    needs_mask = (seq_len % t_chunk) != 0                       # static
    base_t = c * t_chunk

    def step(t, h_prev):
        row = pl.multiple_of(t * bp, bp)
        gi = gi_scratch[pl.ds(row, bp), :]                      # (Bp, 3Hp) f32
        # Only the h_{t-1} @ W_hh^T matmul is on the serial critical path.
        gh = jnp.dot(h_prev.astype(jnp.bfloat16), whh,
                     preferred_element_type=jnp.float32)        # (Bp, 3Hp) f32
        # PyTorch GRU gate order: reset, update, new (lane-aligned Hp slabs).
        r = jax.nn.sigmoid(gi[:, 0:hp] + gh[:, 0:hp])
        z = jax.nn.sigmoid(gi[:, hp:2 * hp] + gh[:, hp:2 * hp])
        n = jnp.tanh(gi[:, 2 * hp:3 * hp] + r * (gh[:, 2 * hp:3 * hp] + bhn))
        h_new = (1.0 - z) * n + z * h_prev
        out_ref[pl.ds(row, bp), :] = h_new.astype(out_ref.dtype)
        if needs_mask:
            # Padded tail steps (T not a multiple of T_CHUNK) must not advance h.
            h_new = jnp.where(base_t + t < seq_len, h_new, h_prev)
        return h_new

    h_last = lax.fori_loop(0, t_chunk, step, h0, unroll=True)
    h_scratch[...] = h_last

    @pl.when(c == pl.num_programs(0) - 1)
    def _finalize():
        hid_ref[...] = h_last.astype(hid_ref.dtype)


def _pack_gate_weights(w, hidden, hp):
    """(3H, H) PyTorch GRU weight -> (Hp, 3Hp) transposed, per-gate lane-padded."""
    slabs = []
    for g in range(3):
        wg_t = w[g * hidden:(g + 1) * hidden, :].T              # (H, H)
        slabs.append(jnp.pad(wg_t, ((0, hp - hidden), (0, hp - hidden))))
    return jnp.concatenate(slabs, axis=1)                        # (Hp, 3Hp)


def _pack_gate_bias(b, hidden, hp):
    """(3H,) PyTorch GRU bias -> (3Hp,) per-gate lane-padded."""
    return jnp.concatenate(
        [jnp.pad(b[g * hidden:(g + 1) * hidden], (0, hp - hidden))
         for g in range(3)])


def init_encoder_rnn_params(key, vocab_size, hidden_size):
    """Deterministic synthetic parameters matching nn.Embedding + nn.GRU shapes."""
    k_emb, k_wih, k_whh, k_bih, k_bhh = jax.random.split(key, 5)
    bound = 1.0 / jnp.sqrt(hidden_size)
    return {
        "embedding": jax.random.normal(k_emb, (vocab_size, hidden_size),
                                       dtype=jnp.float32),
        # PyTorch weight_ih_l0 / weight_hh_l0: (3*H, H); biases: (3*H,)
        "w_ih": jax.random.uniform(k_wih, (3 * hidden_size, hidden_size),
                                   minval=-bound, maxval=bound, dtype=jnp.float32),
        "w_hh": jax.random.uniform(k_whh, (3 * hidden_size, hidden_size),
                                   minval=-bound, maxval=bound, dtype=jnp.float32),
        "b_ih": jax.random.uniform(k_bih, (3 * hidden_size,),
                                   minval=-bound, maxval=bound, dtype=jnp.float32),
        "b_hh": jax.random.uniform(k_bhh, (3 * hidden_size,),
                                   minval=-bound, maxval=bound, dtype=jnp.float32),
    }


def encoder_rnn_forward(token_ids, params, *, t_chunk=16):
    """token_ids: (B, T) int32  ->  (output (B, T, H), hidden (1, B, H))."""
    emb_table = params["embedding"]                              # (V, H)
    B, T = token_ids.shape
    H = emb_table.shape[1]
    assert T >= 1, "EncoderRNN requires at least one time step"

    Hp = _round_up(max(H, 128), 128)                             # lane-dense
    Bp = _round_up(max(B, 8), 8)                                 # f32 sublanes
    t_chunk = max(1, min(t_chunk, T))
    n_chunks = pl.cdiv(T, t_chunk)
    Tp = n_chunks * t_chunk

    # Embedding gather, directly in time-major order (no (B,T,H) HBM transpose).
    # nn.Dropout(p=0.1) is identity in eval mode.
    # TODO(synk): training-mode dropout could use pltpu.prng_seed + stateful_bernoulli.
    # TODO(synk): for small vocabularies, precompute P = embedding @ W_ih^T + bias
    #             (V, 3Hp) once and gather rows of P instead of embedding+matmul.
    emb_tm = jnp.take(emb_table, token_ids.T, axis=0)            # (T, B, H) f32
    emb_tm = jnp.pad(emb_tm, ((0, Tp - T), (0, Bp - B), (0, Hp - H)))
    emb2d = emb_tm.astype(jnp.bfloat16).reshape(Tp * Bp, Hp)     # bf16 MXU input

    wih_t = _pack_gate_weights(params["w_ih"], H, Hp).astype(jnp.bfloat16)
    whh_t = _pack_gate_weights(params["w_hh"], H, Hp).astype(jnp.bfloat16)
    bih_p = _pack_gate_bias(params["b_ih"], H, Hp)               # (3Hp,) f32
    bhh_p = _pack_gate_bias(params["b_hh"], H, Hp)               # (3Hp,) f32

    # Fold biases: gi gets b_ih for all gates plus b_hh for the r/z gates;
    # b_hn must stay inside the r * (...) term, so it is passed separately,
    # pre-broadcast to (Bp, Hp) so the kernel never re-broadcasts it per step.
    gi_bias = (bih_p + bhh_p.at[2 * Hp:].set(0.0)).reshape(1, 3 * Hp)
    bhn = jnp.broadcast_to(bhh_p[2 * Hp:3 * Hp].reshape(1, Hp), (Bp, Hp))

    # Explicit VMEM budget (v7x: 64 MiB physical / 32 MiB default scoped).
    vmem_bytes = (
        2 * 2 * (Hp * 3 * Hp * 2)            # resident bf16 W_ih^T / W_hh^T (x2 buf)
        + 2 * t_chunk * Bp * Hp * 2          # streamed bf16 emb chunks (x2 buf)
        + 2 * t_chunk * Bp * Hp * 4          # streamed f32 out chunks (x2 buf)
        + 2 * Bp * Hp * 4                    # hidden output
        + Bp * Hp * 4                        # h carry scratch
        + t_chunk * Bp * 3 * Hp * 4          # gi chunk scratch
        + 2 * (3 * Hp + Bp * Hp) * 4         # biases
    )
    vmem_limit = int(min(64 * 1024 * 1024, max(4 * 1024 * 1024, 2 * vmem_bytes)))
    # TODO(synk): for H >~ 2K, tile the 3Hp gate axis of the resident weights
    #             instead of keeping all three gates VMEM-resident.

    kernel = functools.partial(_gru_chunk_kernel,
                               t_chunk=t_chunk, bp=Bp, hp=Hp, seq_len=T)

    out2d, hidden_p = pl.pallas_call(
        kernel,
        out_shape=(jax.ShapeDtypeStruct((Tp * Bp, Hp), jnp.float32),
                   jax.ShapeDtypeStruct((Bp, Hp), jnp.float32)),
        grid_spec=pltpu.PrefetchScalarGridSpec(
            num_scalar_prefetch=0,
            grid=(n_chunks,),
            in_specs=[
                # embedding chunk: streamed, auto double-buffered
                pl.BlockSpec((t_chunk * Bp, Hp), lambda c: (c, 0)),
                # W_ih^T / W_hh^T / biases: constant index_map -> VMEM-resident
                pl.BlockSpec((Hp, 3 * Hp), lambda c: (0, 0)),
                pl.BlockSpec((Hp, 3 * Hp), lambda c: (0, 0)),
                pl.BlockSpec((1, 3 * Hp), lambda c: (0, 0)),
                pl.BlockSpec((Bp, Hp), lambda c: (0, 0)),
            ],
            out_specs=[
                pl.BlockSpec((t_chunk * Bp, Hp), lambda c: (c, 0)),
                pl.BlockSpec((Bp, Hp), lambda c: (0, 0)),
            ],
            scratch_shapes=[
                pltpu.VMEM((Bp, Hp), jnp.float32),                # h carry
                pltpu.VMEM((t_chunk * Bp, 3 * Hp), jnp.float32),  # gi chunk
            ],
        ),
        compiler_params=pltpu.CompilerParams(
            dimension_semantics=("arbitrary",),       # serial recurrence over chunks
            vmem_limit_bytes=vmem_limit),
        # TODO(synk): on v7x, add a leading 'parallel' batch-shard grid axis to
        #             use both TensorCores once B >= 16 (>= 8 f32 rows per core).
    )(emb2d, wih_t, whh_t, gi_bias, bhn)

    # TODO(synk): if the downstream consumer accepts time-major (T, B, H) or
    #             bf16 output, skip this transpose / emit bf16 from the kernel.
    out_tm = out2d.reshape(Tp, Bp, Hp)
    output = jnp.transpose(out_tm[:T, :B, :H], (1, 0, 2))        # (B, T, H)
    hidden = hidden_p[:B, :H][None, :, :]                        # (1, B, H)
    return output, hidden


if __name__ == "__main__":
    VOCAB = 20
    HIDDEN = 32
    BATCH = 2
    SEQ = 8

    key = jax.random.PRNGKey(0)
    k_params, k_tokens = jax.random.split(key)

    params = init_encoder_rnn_params(k_params, VOCAB, HIDDEN)
    token_ids = jax.random.randint(k_tokens, (BATCH, SEQ), 0, VOCAB,
                                   dtype=jnp.int32)

    output, hidden = jax.jit(encoder_rnn_forward)(token_ids, params)
    jax.block_until_ready((output, hidden))

    assert output.shape == (BATCH, SEQ, HIDDEN)
    assert hidden.shape == (1, BATCH, HIDDEN)
    assert bool(jnp.all(jnp.isfinite(output)))
    assert bool(jnp.all(jnp.isfinite(hidden)))
    # nn.GRU contract: last output step equals the returned hidden state.
    assert bool(jnp.allclose(output[:, -1, :], hidden[0], atol=1e-6))
    print("KERNEL_OK")
</pallas_src>

<mosaic_0001>
module attributes {stable_mosaic.version = 11 : i64} {
  func.func @_gru_chunk_kernel(%arg0: i32, %arg1: memref<64x128xbf16, #tpu.memory_space<vmem>>, %arg2: memref<128x384xbf16, #tpu.memory_space<vmem>>, %arg3: memref<128x384xbf16, #tpu.memory_space<vmem>>, %arg4: memref<1x384xf32, #tpu.memory_space<vmem>>, %arg5: memref<8x128xf32, #tpu.memory_space<vmem>>, %arg6: memref<64x128xf32, #tpu.memory_space<vmem>>, %arg7: memref<8x128xf32, #tpu.memory_space<vmem>>, %arg8: memref<8x128xf32, #tpu.memory_space<vmem>>, %arg9: memref<64x384xf32, #tpu.memory_space<vmem>>) attributes {dimension_semantics = [#tpu.dimension_semantics<arbitrary>], iteration_bounds = array<i64: 1>, scalar_prefetch = 0 : i64, scratch_operands = 2 : i64, tpu.core_type = #tpu.core_type<tc>, window_params = [{transform_indices = @transform_0, window_bounds = array<i64: 64, 128>}, {pipeline_mode = #tpu.pipeline_mode<synchronous>, transform_indices = @transform_1, window_bounds = array<i64: 128, 384>}, {pipeline_mode = #tpu.pipeline_mode<synchronous>, transform_indices = @transform_2, window_bounds = array<i64: 128, 384>}, {pipeline_mode = #tpu.pipeline_mode<synchronous>, transform_indices = @transform_3, window_bounds = array<i64: 1, 384>}, {pipeline_mode = #tpu.pipeline_mode<synchronous>, transform_indices = @transform_4, window_bounds = array<i64: 8, 128>}, {transform_indices = @transform_5, window_bounds = array<i64: 64, 128>}, {pipeline_mode = #tpu.pipeline_mode<synchronous>, transform_indices = @transform_6, window_bounds = array<i64: 8, 128>}]} {
    %c0_i32 = arith.constant 0 : i32
    %0 = arith.cmpi eq, %arg0, %c0_i32 : i32
    %1 = arith.extui %0 : i1 to i32
    %c0_i32_0 = arith.constant 0 : i32
    %2 = arith.cmpi ne, %1, %c0_i32_0 : i32
    scf.if %2 {
      %cst_75 = arith.constant 0.000000e+00 : f32
      %297 = vector.broadcast %cst_75 : f32 to vector<8x128xf32>
      %c0_76 = arith.constant 0 : index
      %c0_77 = arith.constant 0 : index
      %298 = vector.load %arg8[%c0_76, %c0_77] : memref<8x128xf32, #tpu.memory_space<vmem>>, vector<8x128xf32>
      tpu.vector_store %arg8[%c0_76, %c0_77], %297 {strides = array<i32>} : memref<8x128xf32, #tpu.memory_space<vmem>>, vector<8x128xf32>,
    } else {
    }
    %c0 = arith.constant 0 : index
    %c0_1 = arith.constant 0 : index
    %3 = vector.load %arg1[%c0, %c0_1] : memref<64x128xbf16, #tpu.memory_space<vmem>>, vector<64x128xbf16>
    %c0_2 = arith.constant 0 : index
    %c0_3 = arith.constant 0 : index
    %4 = vector.load %arg2[%c0_2, %c0_3] : memref<128x384xbf16, #tpu.memory_space<vmem>>, vector<128x384xbf16>
    %cst = arith.constant dense<0.000000e+00> : vector<64x384xf32>
    %5 = tpu.matmul %3, %4, %cst {dimension_numbers = #tpu.dot_dimension_numbers<[1], [0], [0], [1], [0, 0, 1, 1], [], []>} : vector<64x128xbf16>, vector<128x384xbf16>, vector<64x384xf32> -> vector<64x384xf32>
    %c0_4 = arith.constant 0 : index
    %c0_5 = arith.constant 0 : index
    %6 = vector.load %arg4[%c0_4, %c0_5] : memref<1x384xf32, #tpu.memory_space<vmem>>, vector<1x384xf32>
    %7 = vector.broadcast %6 : vector<1x384xf32> to vector<64x384xf32>
    %8 = arith.addf %5, %7 : vector<64x384xf32>
    %c0_6 = arith.constant 0 : index
    %c0_7 = arith.constant 0 : index
    %9 = vector.load %arg9[%c0_6, %c0_7] : memref<64x384xf32, #tpu.memory_space<vmem>>, vector<64x384xf32>
    tpu.vector_store %arg9[%c0_6, %c0_7], %8 {strides = array<i32>} : memref<64x384xf32, #tpu.memory_space<vmem>>, vector<64x384xf32>,
    %c0_8 = arith.constant 0 : index
    %c0_9 = arith.constant 0 : index
    %10 = vector.load %arg5[%c0_8, %c0_9] : memref<8x128xf32, #tpu.memory_space<vmem>>, vector<8x128xf32>
    %c0_10 = arith.constant 0 : index
    %c0_11 = arith.constant 0 : index
    %11 = vector.load %arg3[%c0_10, %c0_11] : memref<128x384xbf16, #tpu.memory_space<vmem>>, vector<128x384xbf16>
    %c0_12 = arith.constant 0 : index
    %c0_13 = arith.constant 0 : index
    %12 = vector.load %arg8[%c0_12, %c0_13] : memref<8x128xf32, #tpu.memory_space<vmem>>, vector<8x128xf32>
    %c0_i32_14 = arith.constant 0 : i32
    %c8_i32 = arith.constant 8 : i32
    %13 = arith.muli %c0_i32_14, %c8_i32 : i32
    %14 = tpu.assume_multiple %13, 8 : i32
    %15 = arith.index_cast %14 : i32 to index
    %c0_15 = arith.constant 0 : index
    %16 = vector.load %arg9[%15, %c0_15] : memref<64x384xf32, #tpu.memory_space<vmem>>, vector<8x384xf32>
    %17 = arith.truncf %12 : vector<8x128xf32> to vector<8x128xbf16>
    %cst_16 = arith.constant dense<0.000000e+00> : vector<8x384xf32>
    %18 = tpu.matmul %17, %11, %cst_16 {dimension_numbers = #tpu.dot_dimension_numbers<[1], [0], [0], [1], [0, 0, 1, 1], [], []>} : vector<8x128xbf16>, vector<128x384xbf16>, vector<8x384xf32> -> vector<8x384xf32>
    %19 = vector.extract_strided_slice %16 {offsets = [0, 0], sizes = [8, 128], strides = [1, 1]} : vector<8x384xf32> to vector<8x128xf32>
    %20 = vector.extract_strided_slice %18 {offsets = [0, 0], sizes = [8, 128], strides = [1, 1]} : vector<8x384xf32> to vector<8x128xf32>
    %21 = arith.addf %19, %20 : vector<8x128xf32>
    %22 = arith.negf %21 : vector<8x128xf32>
    %23 = math.exp %22 : vector<8x128xf32>
    %cst_17 = arith.constant 1.000000e+00 : f32
    %24 = vector.broadcast %cst_17 : f32 to vector<8x128xf32>
    %25 = arith.addf %24, %23 : vector<8x128xf32>
    %26 = arith.divf %24, %25 : vector<8x128xf32>
    %27 = vector.extract_strided_slice %16 {offsets = [0, 128], sizes = [8, 128], strides = [1, 1]} : vector<8x384xf32> to vector<8x128xf32>
    %28 = vector.extract_strided_slice %18 {offsets = [0, 128], sizes = [8, 128], strides = [1, 1]} : vector<8x384xf32> to vector<8x128xf32>
    %29 = arith.addf %27, %28 : vector<8x128xf32>
    %30 = arith.negf %29 : vector<8x128xf32>
    %31 = math.exp %30 : vector<8x128xf32>
    %cst_18 = arith.constant 1.000000e+00 : f32
    %32 = vector.broadcast %cst_18 : f32 to vector<8x128xf32>
    %33 = arith.addf %32, %31 : vector<8x128xf32>
    %34 = arith.divf %32, %33 : vector<8x128xf32>
    %35 = vector.extract_strided_slice %16 {offsets = [0, 256], sizes = [8, 128], strides = [1, 1]} : vector<8x384xf32> to vector<8x128xf32>
    %36 = vector.extract_strided_slice %18 {offsets = [0, 256], sizes = [8, 128], strides = [1, 1]} : vector<8x384xf32> to vector<8x128xf32>
    %37 = arith.addf %36, %10 : vector<8x128xf32>
    %38 = arith.mulf %26, %37 : vector<8x128xf32>
    %39 = arith.addf %35, %38 : vector<8x128xf32>
    %40 = math.tanh %39 : vector<8x128xf32>
    %cst_19 = arith.constant 1.000000e+00 : f32
    %41 = vector.broadcast %cst_19 : f32 to vector<8x128xf32>
    %42 = arith.subf %41, %34 : vector<8x128xf32>
    %43 = arith.mulf %42, %40 : vector<8x128xf32>
    %44 = arith.mulf %34, %12 : vector<8x128xf32>
    %45 = arith.addf %43, %44 : vector<8x128xf32>
    %46 = arith.index_cast %14 : i32 to index
    %c0_20 = arith.constant 0 : index
    %47 = vector.load %arg6[%46, %c0_20] : memref<64x128xf32, #tpu.memory_space<vmem>>, vector<8x128xf32>
    tpu.vector_store %arg6[%46, %c0_20], %45 {strides = array<i32>} : memref<64x128xf32, #tpu.memory_space<vmem>>, vector<8x128xf32>,
    %c1_i32 = arith.constant 1 : i32
    %c8_i32_21 = arith.constant 8 : i32
    %48 = arith.muli %c1_i32, %c8_i32_21 : i32
    %49 = tpu.assume_multiple %48, 8 : i32
    %50 = arith.index_cast %49 : i32 to index
    %c0_22 = arith.constant 0 : index
    %51 = vector.load %arg9[%50, %c0_22] : memref<64x384xf32, #tpu.memory_space<vmem>>, vector<8x384xf32>
    %52 = arith.truncf %45 : vector<8x128xf32> to vector<8x128xbf16>
    %cst_23 = arith.constant dense<0.000000e+00> : vector<8x384xf32>
    %53 = tpu.matmul %52, %11, %cst_23 {dimension_numbers = #tpu.dot_dimension_numbers<[1], [0], [0], [1], [0, 0, 1, 1], [], []>} : vector<8x128xbf16>, vector<128x384xbf16>, vector<8x384xf32> -> vector<8x384xf32>
    %54 = vector.extract_strided_slice %51 {offsets = [0, 0], sizes = [8, 128], strides = [1, 1]} : vector<8x384xf32> to vector<8x128xf32>
    %55 = vector.extract_strided_slice %53 {offsets = [0, 0], sizes = [8, 128], strides = [1, 1]} : vector<8x384xf32> to vector<8x128xf32>
    %56 = arith.addf %54, %55 : vector<8x128xf32>
    %57 = arith.negf %56 : vector<8x128xf32>
    %58 = math.exp %57 : vector<8x128xf32>
    %cst_24 = arith.constant 1.000000e+00 : f32
    %59 = vector.broadcast %cst_24 : f32 to vector<8x128xf32>
    %60 = arith.addf %59, %58 : vector<8x128xf32>
    %61 = arith.divf %59, %60 : vector<8x128xf32>
    %62 = vector.extract_strided_slice %51 {offsets = [0, 128], sizes = [8, 128], strides = [1, 1]} : vector<8x384xf32> to vector<8x128xf32>
    %63 = vector.extract_strided_slice %53 {offsets = [0, 128], sizes = [8, 128], strides = [1, 1]} : vector<8x384xf32> to vector<8x128xf32>
    %64 = arith.addf %62, %63 : vector<8x128xf32>
    %65 = arith.negf %64 : vector<8x128xf32>
    %66 = math.exp %65 : vector<8x128xf32>
    %cst_25 = arith.constant 1.000000e+00 : f32
    %67 = vector.broadcast %cst_25 : f32 to vector<8x128xf32>
    %68 = arith.addf %67, %66 : vector<8x128xf32>
    %69 = arith.divf %67, %68 : vector<8x128xf32>
    %70 = vector.extract_strided_slice %51 {offsets = [0, 256], sizes = [8, 128], strides = [1, 1]} : vector<8x384xf32> to vector<8x128xf32>
    %71 = vector.extract_strided_slice %53 {offsets = [0, 256], sizes = [8, 128], strides = [1, 1]} : vector<8x384xf32> to vector<8x128xf32>
    %72 = arith.addf %71, %10 : vector<8x128xf32>
    %73 = arith.mulf %61, %72 : vector<8x128xf32>
    %74 = arith.addf %70, %73 : vector<8x128xf32>
    %75 = math.tanh %74 : vector<8x128xf32>
    %cst_26 = arith.constant 1.000000e+00 : f32
    %76 = vector.broadcast %cst_26 : f32 to vector<8x128xf32>
    %77 = arith.subf %76, %69 : vector<8x128xf32>
    %78 = arith.mulf %77, %75 : vector<8x128xf32>
    %79 = arith.mulf %69, %45 : vector<8x128xf32>
    %80 = arith.addf %78, %79 : vector<8x128xf32>
    %81 = arith.index_cast %49 : i32 to index
    %c0_27 = arith.constant 0 : index
    %82 = vector.load %arg6[%81, %c0_27] : memref<64x128xf32, #tpu.memory_space<vmem>>, vector<8x128xf32>
    tpu.vector_store %arg6[%81, %c0_27], %80 {strides = array<i32>} : memref<64x128xf32, #tpu.memory_space<vmem>>, vector<8x128xf32>,
    %c2_i32 = arith.constant 2 : i32
    %c8_i32_28 = arith.constant 8 : i32
    %83 = arith.muli %c2_i32, %c8_i32_28 : i32
    %84 = tpu.assume_multiple %83, 8 : i32
    %85 = arith.index_cast %84 : i32 to index
    %c0_29 = arith.constant 0 : index
    %86 = vector.load %arg9[%85, %c0_29] : memref<64x384xf32, #tpu.memory_space<vmem>>, vector<8x384xf32>
    %87 = arith.truncf %80 : vector<8x128xf32> to vector<8x128xbf16>
    %cst_30 = arith.constant dense<0.000000e+00> : vector<8x384xf32>
    %88 = tpu.matmul %87, %11, %cst_30 {dimension_numbers = #tpu.dot_dimension_numbers<[1], [0], [0], [1], [0, 0, 1, 1], [], []>} : vector<8x128xbf16>, vector<128x384xbf16>, vector<8x384xf32> -> vector<8x384xf32>
    %89 = vector.extract_strided_slice %86 {offsets = [0, 0], sizes = [8, 128], strides = [1, 1]} : vector<8x384xf32> to vector<8x128xf32>
    %90 = vector.extract_strided_slice %88 {offsets = [0, 0], sizes = [8, 128], strides = [1, 1]} : vector<8x384xf32> to vector<8x128xf32>
    %91 = arith.addf %89, %90 : vector<8x128xf32>
    %92 = arith.negf %91 : vector<8x128xf32>
    %93 = math.exp %92 : vector<8x128xf32>
    %cst_31 = arith.constant 1.000000e+00 : f32
    %94 = vector.broadcast %cst_31 : f32 to vector<8x128xf32>
    %95 = arith.addf %94, %93 : vector<8x128xf32>
    %96 = arith.divf %94, %95 : vector<8x128xf32>
    %97 = vector.extract_strided_slice %86 {offsets = [0, 128], sizes = [8, 128], strides = [1, 1]} : vector<8x384xf32> to vector<8x128xf32>
    %98 = vector.extract_strided_slice %88 {offsets = [0, 128], sizes = [8, 128], strides = [1, 1]} : vector<8x384xf32> to vector<8x128xf32>
    %99 = arith.addf %97, %98 : vector<8x128xf32>
    %100 = arith.negf %99 : vector<8x128xf32>
    %101 = math.exp %100 : vector<8x128xf32>
    %cst_32 = arith.constant 1.000000e+00 : f32
    %102 = vector.broadcast %cst_32 : f32 to vector<8x128xf32>
    %103 = arith.addf %102, %101 : vector<8x128xf32>
    %104 = arith.divf %102, %103 : vector<8x128xf32>
    %105 = vector.extract_strided_slice %86 {offsets = [0, 256], sizes = [8, 128], strides = [1, 1]} : vector<8x384xf32> to vector<8x128xf32>
    %106 = vector.extract_strided_slice %88 {offsets = [0, 256], sizes = [8, 128], strides = [1, 1]} : vector<8x384xf32> to vector<8x128xf32>
    %107 = arith.addf %106, %10 : vector<8x128xf32>
    %108 = arith.mulf %96, %107 : vector<8x128xf32>
    %109 = arith.addf %105, %108 : vector<8x128xf32>
    %110 = math.tanh %109 : vector<8x128xf32>
    %cst_33 = arith.constant 1.000000e+00 : f32
    %111 = vector.broadcast %cst_33 : f32 to vector<8x128xf32>
    %112 = arith.subf %111, %104 : vector<8x128xf32>
    %113 = arith.mulf %112, %110 : vector<8x128xf32>
    %114 = arith.mulf %104, %80 : vector<8x128xf32>
    %115 = arith.addf %113, %114 : vector<8x128xf32>
    %116 = arith.index_cast %84 : i32 to index
    %c0_34 = arith.constant 0 : index
    %117 = vector.load %arg6[%116, %c0_34] : memref<64x128xf32, #tpu.memory_space<vmem>>, vector<8x128xf32>
    tpu.vector_store %arg6[%116, %c0_34], %115 {strides = array<i32>} : memref<64x128xf32, #tpu.memory_space<vmem>>, vector<8x128xf32>,
    %c3_i32 = arith.constant 3 : i32
    %c8_i32_35 = arith.constant 8 : i32
    %118 = arith.muli %c3_i32, %c8_i32_35 : i32
    %119 = tpu.assume_multiple %118, 8 : i32
    %120 = arith.index_cast %119 : i32 to index
    %c0_36 = arith.constant 0 : index
    %121 = vector.load %arg9[%120, %c0_36] : memref<64x384xf32, #tpu.memory_space<vmem>>, vector<8x384xf32>
    %122 = arith.truncf %115 : vector<8x128xf32> to vector<8x128xbf16>
    %cst_37 = arith.constant dense<0.000000e+00> : vector<8x384xf32>
    %123 = tpu.matmul %122, %11, %cst_37 {dimension_numbers = #tpu.dot_dimension_numbers<[1], [0], [0], [1], [0, 0, 1, 1], [], []>} : vector<8x128xbf16>, vector<128x384xbf16>, vector<8x384xf32> -> vector<8x384xf32>
    %124 = vector.extract_strided_slice %121 {offsets = [0, 0], sizes = [8, 128], strides = [1, 1]} : vector<8x384xf32> to vector<8x128xf32>
    %125 = vector.extract_strided_slice %123 {offsets = [0, 0], sizes = [8, 128], strides = [1, 1]} : vector<8x384xf32> to vector<8x128xf32>
    %126 = arith.addf %124, %125 : vector<8x128xf32>
    %127 = arith.negf %126 : vector<8x128xf32>
    %128 = math.exp %127 : vector<8x128xf32>
    %cst_38 = arith.constant 1.000000e+00 : f32
    %129 = vector.broadcast %cst_38 : f32 to vector<8x128xf32>
    %130 = arith.addf %129, %128 : vector<8x128xf32>
    %131 = arith.divf %129, %130 : vector<8x128xf32>
    %132 = vector.extract_strided_slice %121 {offsets = [0, 128], sizes = [8, 128], strides = [1, 1]} : vector<8x384xf32> to vector<8x128xf32>
    %133 = vector.extract_strided_slice %123 {offsets = [0, 128], sizes = [8, 128], strides = [1, 1]} : vector<8x384xf32> to vector<8x128xf32>
    %134 = arith.addf %132, %133 : vector<8x128xf32>
    %135 = arith.negf %134 : vector<8x128xf32>
    %136 = math.exp %135 : vector<8x128xf32>
    %cst_39 = arith.constant 1.000000e+00 : f32
    %137 = vector.broadcast %cst_39 : f32 to vector<8x128xf32>
    %138 = arith.addf %137, %136 : vector<8x128xf32>
    %139 = arith.divf %137, %138 : vector<8x128xf32>
    %140 = vector.extract_strided_slice %121 {offsets = [0, 256], sizes = [8, 128], strides = [1, 1]} : vector<8x384xf32> to vector<8x128xf32>
    %141 = vector.extract_strided_slice %123 {offsets = [0, 256], sizes = [8, 128], strides = [1, 1]} : vector<8x384xf32> to vector<8x128xf32>
    %142 = arith.addf %141, %10 : vector<8x128xf32>
    %143 = arith.mulf %131, %142 : vector<8x128xf32>
    %144 = arith.addf %140, %143 : vector<8x128xf32>
    %145 = math.tanh %144 : vector<8x128xf32>
    %cst_40 = arith.constant 1.000000e+00 : f32
    %146 = vector.broadcast %cst_40 : f32 to vector<8x128xf32>
    %147 = arith.subf %146, %139 : vector<8x128xf32>
    %148 = arith.mulf %147, %145 : vector<8x128xf32>
    %149 = arith.mulf %139, %115 : vector<8x128xf32>
    %150 = arith.addf %148, %149 : vector<8x128xf32>
    %151 = arith.index_cast %119 : i32 to index
    %c0_41 = arith.constant 0 : index
    %152 = vector.load %arg6[%151, %c0_41] : memref<64x128xf32, #tpu.memory_space<vmem>>, vector<8x128xf32>
    tpu.vector_store %arg6[%151, %c0_41], %150 {strides = array<i32>} : memref<64x128xf32, #tpu.memory_space<vmem>>, vector<8x128xf32>,
    %c4_i32 = arith.constant 4 : i32
    %c8_i32_42 = arith.constant 8 : i32
    %153 = arith.muli %c4_i32, %c8_i32_42 : i32
    %154 = tpu.assume_multiple %153, 8 : i32
    %155 = arith.index_cast %154 : i32 to index
    %c0_43 = arith.constant 0 : index
    %156 = vector.load %arg9[%155, %c0_43] : memref<64x384xf32, #tpu.memory_space<vmem>>, vector<8x384xf32>
    %157 = arith.truncf %150 : vector<8x128xf32> to vector<8x128xbf16>
    %cst_44 = arith.constant dense<0.000000e+00> : vector<8x384xf32>
    %158 = tpu.matmul %157, %11, %cst_44 {dimension_numbers = #tpu.dot_dimension_numbers<[1], [0], [0], [1], [0, 0, 1, 1], [], []>} : vector<8x128xbf16>, vector<128x384xbf16>, vector<8x384xf32> -> vector<8x384xf32>
    %159 = vector.extract_strided_slice %156 {offsets = [0, 0], sizes = [8, 128], strides = [1, 1]} : vector<8x384xf32> to vector<8x128xf32>
    %160 = vector.extract_strided_slice %158 {offsets = [0, 0], sizes = [8, 128], strides = [1, 1]} : vector<8x384xf32> to vector<8x128xf32>
    %161 = arith.addf %159, %160 : vector<8x128xf32>
    %162 = arith.negf %161 : vector<8x128xf32>
    %163 = math.exp %162 : vector<8x128xf32>
    %cst_45 = arith.constant 1.000000e+00 : f32
    %164 = vector.broadcast %cst_45 : f32 to vector<8x128xf32>
    %165 = arith.addf %164, %163 : vector<8x128xf32>
    %166 = arith.divf %164, %165 : vector<8x128xf32>
    %167 = vector.extract_strided_slice %156 {offsets = [0, 128], sizes = [8, 128], strides = [1, 1]} : vector<8x384xf32> to vector<8x128xf32>
    %168 = vector.extract_strided_slice %158 {offsets = [0, 128], sizes = [8, 128], strides = [1, 1]} : vector<8x384xf32> to vector<8x128xf32>
    %169 = arith.addf %167, %168 : vector<8x128xf32>
    %170 = arith.negf %169 : vector<8x128xf32>
    %171 = math.exp %170 : vector<8x128xf32>
    %cst_46 = arith.constant 1.000000e+00 : f32
    %172 = vector.broadcast %cst_46 : f32 to vector<8x128xf32>
    %173 = arith.addf %172, %171 : vector<8x128xf32>
    %174 = arith.divf %172, %173 : vector<8x128xf32>
    %175 = vector.extract_strided_slice %156 {offsets = [0, 256], sizes = [8, 128], strides = [1, 1]} : vector<8x384xf32> to vector<8x128xf32>
    %176 = vector.extract_strided_slice %158 {offsets = [0, 256], sizes = [8, 128], strides = [1, 1]} : vector<8x384xf32> to vector<8x128xf32>
    %177 = arith.addf %176, %10 : vector<8x128xf32>
    %178 = arith.mulf %166, %177 : vector<8x128xf32>
    %179 = arith.addf %175, %178 : vector<8x128xf32>
    %180 = math.tanh %179 : vector<8x128xf32>
    %cst_47 = arith.constant 1.000000e+00 : f32
    %181 = vector.broadcast %cst_47 : f32 to vector<8x128xf32>
    %182 = arith.subf %181, %174 : vector<8x128xf32>
    %183 = arith.mulf %182, %180 : vector<8x128xf32>
    %184 = arith.mulf %174, %150 : vector<8x128xf32>
    %185 = arith.addf %183, %184 : vector<8x128xf32>
    %186 = arith.index_cast %154 : i32 to index
    %c0_48 = arith.constant 0 : index
    %187 = vector.load %arg6[%186, %c0_48] : memref<64x128xf32, #tpu.memory_space<vmem>>, vector<8x128xf32>
    tpu.vector_store %arg6[%186, %c0_48], %185 {strides = array<i32>} : memref<64x128xf32, #tpu.memory_space<vmem>>, vector<8x128xf32>,
    %c5_i32 = arith.constant 5 : i32
    %c8_i32_49 = arith.constant 8 : i32
    %188 = arith.muli %c5_i32, %c8_i32_49 : i32
    %189 = tpu.assume_multiple %188, 8 : i32
    %190 = arith.index_cast %189 : i32 to index
    %c0_50 = arith.constant 0 : index
    %191 = vector.load %arg9[%190, %c0_50] : memref<64x384xf32, #tpu.memory_space<vmem>>, vector<8x384xf32>
    %192 = arith.truncf %185 : vector<8x128xf32> to vector<8x128xbf16>
    %cst_51 = arith.constant dense<0.000000e+00> : vector<8x384xf32>
    %193 = tpu.matmul %192, %11, %cst_51 {dimension_numbers = #tpu.dot_dimension_numbers<[1], [0], [0], [1], [0, 0, 1, 1], [], []>} : vector<8x128xbf16>, vector<128x384xbf16>, vector<8x384xf32> -> vector<8x384xf32>
    %194 = vector.extract_strided_slice %191 {offsets = [0, 0], sizes = [8, 128], strides = [1, 1]} : vector<8x384xf32> to vector<8x128xf32>
    %195 = vector.extract_strided_slice %193 {offsets = [0, 0], sizes = [8, 128], strides = [1, 1]} : vector<8x384xf32> to vector<8x128xf32>
    %196 = arith.addf %194, %195 : vector<8x128xf32>
    %197 = arith.negf %196 : vector<8x128xf32>
    %198 = math.exp %197 : vector<8x128xf32>
    %cst_52 = arith.constant 1.000000e+00 : f32
    %199 = vector.broadcast %cst_52 : f32 to vector<8x128xf32>
    %200 = arith.addf %199, %198 : vector<8x128xf32>
    %201 = arith.divf %199, %200 : vector<8x128xf32>
    %202 = vector.extract_strided_slice %191 {offsets = [0, 128], sizes = [8, 128], strides = [1, 1]} : vector<8x384xf32> to vector<8x128xf32>
    %203 = vector.extract_strided_slice %193 {offsets = [0, 128], sizes = [8, 128], strides = [1, 1]} : vector<8x384xf32> to vector<8x128xf32>
    %204 = arith.addf %202, %203 : vector<8x128xf32>
    %205 = arith.negf %204 : vector<8x128xf32>
    %206 = math.exp %205 : vector<8x128xf32>
    %cst_53 = arith.constant 1.000000e+00 : f32
    %207 = vector.broadcast %cst_53 : f32 to vector<8x128xf32>
    %208 = arith.addf %207, %206 : vector<8x128xf32>
    %209 = arith.divf %207, %208 : vector<8x128xf32>
    %210 = vector.extract_strided_slice %191 {offsets = [0, 256], sizes = [8, 128], strides = [1, 1]} : vector<8x384xf32> to vector<8x128xf32>
    %211 = vector.extract_strided_slice %193 {offsets = [0, 256], sizes = [8, 128], strides = [1, 1]} : vector<8x384xf32> to vector<8x128xf32>
    %212 = arith.addf %211, %10 : vector<8x128xf32>
    %213 = arith.mulf %201, %212 : vector<8x128xf32>
    %214 = arith.addf %210, %213 : vector<8x128xf32>
    %215 = math.tanh %214 : vector<8x128xf32>
    %cst_54 = arith.constant 1.000000e+00 : f32
    %216 = vector.broadcast %cst_54 : f32 to vector<8x128xf32>
    %217 = arith.subf %216, %209 : vector<8x128xf32>
    %218 = arith.mulf %217, %215 : vector<8x128xf32>
    %219 = arith.mulf %209, %185 : vector<8x128xf32>
    %220 = arith.addf %218, %219 : vector<8x128xf32>
    %221 = arith.index_cast %189 : i32 to index
    %c0_55 = arith.constant 0 : index
    %222 = vector.load %arg6[%221, %c0_55] : memref<64x128xf32, #tpu.memory_space<vmem>>, vector<8x128xf32>
    tpu.vector_store %arg6[%221, %c0_55], %220 {strides = array<i32>} : memref<64x128xf32, #tpu.memory_space<vmem>>, vector<8x128xf32>,
    %c6_i32 = arith.constant 6 : i32
    %c8_i32_56 = arith.constant 8 : i32
    %223 = arith.muli %c6_i32, %c8_i32_56 : i32
    %224 = tpu.assume_multiple %223, 8 : i32
    %225 = arith.index_cast %224 : i32 to index
    %c0_57 = arith.constant 0 : index
    %226 = vector.load %arg9[%225, %c0_57] : memref<64x384xf32, #tpu.memory_space<vmem>>, vector<8x384xf32>
    %227 = arith.truncf %220 : vector<8x128xf32> to vector<8x128xbf16>
    %cst_58 = arith.constant dense<0.000000e+00> : vector<8x384xf32>
    %228 = tpu.matmul %227, %11, %cst_58 {dimension_numbers = #tpu.dot_dimension_numbers<[1], [0], [0], [1], [0, 0, 1, 1], [], []>} : vector<8x128xbf16>, vector<128x384xbf16>, vector<8x384xf32> -> vector<8x384xf32>
    %229 = vector.extract_strided_slice %226 {offsets = [0, 0], sizes = [8, 128], strides = [1, 1]} : vector<8x384xf32> to vector<8x128xf32>
    %230 = vector.extract_strided_slice %228 {offsets = [0, 0], sizes = [8, 128], strides = [1, 1]} : vector<8x384xf32> to vector<8x128xf32>
    %231 = arith.addf %229, %230 : vector<8x128xf32>
    %232 = arith.negf %231 : vector<8x128xf32>
    %233 = math.exp %232 : vector<8x128xf32>
    %cst_59 = arith.constant 1.000000e+00 : f32
    %234 = vector.broadcast %cst_59 : f32 to vector<8x128xf32>
    %235 = arith.addf %234, %233 : vector<8x128xf32>
    %236 = arith.divf %234, %235 : vector<8x128xf32>
    %237 = vector.extract_strided_slice %226 {offsets = [0, 128], sizes = [8, 128], strides = [1, 1]} : vector<8x384xf32> to vector<8x128xf32>
    %238 = vector.extract_strided_slice %228 {offsets = [0, 128], sizes = [8, 128], strides = [1, 1]} : vector<8x384xf32> to vector<8x128xf32>
    %239 = arith.addf %237, %238 : vector<8x128xf32>
    %240 = arith.negf %239 : vector<8x128xf32>
    %241 = math.exp %240 : vector<8x128xf32>
    %cst_60 = arith.constant 1.000000e+00 : f32
    %242 = vector.broadcast %cst_60 : f32 to vector<8x128xf32>
    %243 = arith.addf %242, %241 : vector<8x128xf32>
    %244 = arith.divf %242, %243 : vector<8x128xf32>
    %245 = vector.extract_strided_slice %226 {offsets = [0, 256], sizes = [8, 128], strides = [1, 1]} : vector<8x384xf32> to vector<8x128xf32>
    %246 = vector.extract_strided_slice %228 {offsets = [0, 256], sizes = [8, 128], strides = [1, 1]} : vector<8x384xf32> to vector<8x128xf32>
    %247 = arith.addf %246, %10 : vector<8x128xf32>
    %248 = arith.mulf %236, %247 : vector<8x128xf32>
    %249 = arith.addf %245, %248 : vector<8x128xf32>
    %250 = math.tanh %249 : vector<8x128xf32>
    %cst_61 = arith.constant 1.000000e+00 : f32
    %251 = vector.broadcast %cst_61 : f32 to vector<8x128xf32>
    %252 = arith.subf %251, %244 : vector<8x128xf32>
    %253 = arith.mulf %252, %250 : vector<8x128xf32>
    %254 = arith.mulf %244, %220 : vector<8x128xf32>
    %255 = arith.addf %253, %254 : vector<8x128xf32>
    %256 = arith.index_cast %224 : i32 to index
    %c0_62 = arith.constant 0 : index
    %257 = vector.load %arg6[%256, %c0_62] : memref<64x128xf32, #tpu.memory_space<vmem>>, vector<8x128xf32>
    tpu.vector_store %arg6[%256, %c0_62], %255 {strides = array<i32>} : memref<64x128xf32, #tpu.memory_space<vmem>>, vector<8x128xf32>,
    %c7_i32 = arith.constant 7 : i32
    %c8_i32_63 = arith.constant 8 : i32
    %258 = arith.muli %c7_i32, %c8_i32_63 : i32
    %259 = tpu.assume_multiple %258, 8 : i32
    %260 = arith.index_cast %259 : i32 to index
    %c0_64 = arith.constant 0 : index
    %261 = vector.load %arg9[%260, %c0_64] : memref<64x384xf32, #tpu.memory_space<vmem>>, vector<8x384xf32>
    %262 = arith.truncf %255 : vector<8x128xf32> to vector<8x128xbf16>
    %cst_65 = arith.constant dense<0.000000e+00> : vector<8x384xf32>
    %263 = tpu.matmul %262, %11, %cst_65 {dimension_numbers = #tpu.dot_dimension_numbers<[1], [0], [0], [1], [0, 0, 1, 1], [], []>} : vector<8x128xbf16>, vector<128x384xbf16>, vector<8x384xf32> -> vector<8x384xf32>
    %264 = vector.extract_strided_slice %261 {offsets = [0, 0], sizes = [8, 128], strides = [1, 1]} : vector<8x384xf32> to vector<8x128xf32>
    %265 = vector.extract_strided_slice %263 {offsets = [0, 0], sizes = [8, 128], strides = [1, 1]} : vector<8x384xf32> to vector<8x128xf32>
    %266 = arith.addf %264, %265 : vector<8x128xf32>
    %267 = arith.negf %266 : vector<8x128xf32>
    %268 = math.exp %267 : vector<8x128xf32>
    %cst_66 = arith.constant 1.000000e+00 : f32
    %269 = vector.broadcast %cst_66 : f32 to vector<8x128xf32>
    %270 = arith.addf %269, %268 : vector<8x128xf32>
    %271 = arith.divf %269, %270 : vector<8x128xf32>
    %272 = vector.extract_strided_slice %261 {offsets = [0, 128], sizes = [8, 128], strides = [1, 1]} : vector<8x384xf32> to vector<8x128xf32>
    %273 = vector.extract_strided_slice %263 {offsets = [0, 128], sizes = [8, 128], strides = [1, 1]} : vector<8x384xf32> to vector<8x128xf32>
    %274 = arith.addf %272, %273 : vector<8x128xf32>
    %275 = arith.negf %274 : vector<8x128xf32>
    %276 = math.exp %275 : vector<8x128xf32>
    %cst_67 = arith.constant 1.000000e+00 : f32
    %277 = vector.broadcast %cst_67 : f32 to vector<8x128xf32>
    %278 = arith.addf %277, %276 : vector<8x128xf32>
    %279 = arith.divf %277, %278 : vector<8x128xf32>
    %280 = vector.extract_strided_slice %261 {offsets = [0, 256], sizes = [8, 128], strides = [1, 1]} : vector<8x384xf32> to vector<8x128xf32>
    %281 = vector.extract_strided_slice %263 {offsets = [0, 256], sizes = [8, 128], strides = [1, 1]} : vector<8x384xf32> to vector<8x128xf32>
    %282 = arith.addf %281, %10 : vector<8x128xf32>
    %283 = arith.mulf %271, %282 : vector<8x128xf32>
    %284 = arith.addf %280, %283 : vector<8x128xf32>
    %285 = math.tanh %284 : vector<8x128xf32>
    %cst_68 = arith.constant 1.000000e+00 : f32
    %286 = vector.broadcast %cst_68 : f32 to vector<8x128xf32>
    %287 = arith.subf %286, %279 : vector<8x128xf32>
    %288 = arith.mulf %287, %285 : vector<8x128xf32>
    %289 = arith.mulf %279, %255 : vector<8x128xf32>
    %290 = arith.addf %288, %289 : vector<8x128xf32>
    %291 = arith.index_cast %259 : i32 to index
    %c0_69 = arith.constant 0 : index
    %292 = vector.load %arg6[%291, %c0_69] : memref<64x128xf32, #tpu.memory_space<vmem>>, vector<8x128xf32>
    tpu.vector_store %arg6[%291, %c0_69], %290 {strides = array<i32>} : memref<64x128xf32, #tpu.memory_space<vmem>>, vector<8x128xf32>,
    %c8_i32_70 = arith.constant 8 : i32
    %c0_71 = arith.constant 0 : index
    %c0_72 = arith.constant 0 : index
    %293 = vector.load %arg8[%c0_71, %c0_72] : memref<8x128xf32, #tpu.memory_space<vmem>>, vector<8x128xf32>
    tpu.vector_store %arg8[%c0_71, %c0_72], %290 {strides = array<i32>} : memref<8x128xf32, #tpu.memory_space<vmem>>, vector<8x128xf32>,
    %c0_i32_73 = arith.constant 0 : i32
    %294 = arith.cmpi eq, %arg0, %c0_i32_73 : i32
    %295 = arith.extui %294 : i1 to i32
    %c0_i32_74 = arith.constant 0 : i32
    %296 = arith.cmpi ne, %295, %c0_i32_74 : i32
    scf.if %296 {
      %c0_75 = arith.constant 0 : index
      %c0_76 = arith.constant 0 : index
      %297 = vector.load %arg7[%c0_75, %c0_76] : memref<8x128xf32, #tpu.memory_space<vmem>>, vector<8x128xf32>
      tpu.vector_store %arg7[%c0_75, %c0_76], %290 {strides = array<i32>} : memref<8x128xf32, #tpu.memory_space<vmem>>, vector<8x128xf32>,
    } else {
    }
    return
  }
  func.func @transform_0(%arg0: i32) -> (i32, i32) {
    %c0_i32 = arith.constant 0 : i32
    %c0_i32_0 = arith.constant 0 : i32
    return %arg0, %c0_i32 : i32, i32
  }
  func.func @transform_1(%arg0: i32) -> (i32, i32) {
    %c0_i32 = arith.constant 0 : i32
    %c0_i32_0 = arith.constant 0 : i32
    %c0_i32_1 = arith.constant 0 : i32
    return %c0_i32, %c0_i32_0 : i32, i32
  }
  func.func @transform_2(%arg0: i32) -> (i32, i32) {
    %c0_i32 = arith.constant 0 : i32
    %c0_i32_0 = arith.constant 0 : i32
    %c0_i32_1 = arith.constant 0 : i32
    return %c0_i32, %c0_i32_0 : i32, i32
  }
  func.func @transform_3(%arg0: i32) -> (i32, i32) {
    %c0_i32 = arith.constant 0 : i32
    %c0_i32_0 = arith.constant 0 : i32
    %c0_i32_1 = arith.constant 0 : i32
    return %c0_i32, %c0_i32_0 : i32, i32
  }
  func.func @transform_4(%arg0: i32) -> (i32, i32) {
    %c0_i32 = arith.constant 0 : i32
    %c0_i32_0 = arith.constant 0 : i32
    %c0_i32_1 = arith.constant 0 : i32
    return %c0_i32, %c0_i32_0 : i32, i32
  }
  func.func @transform_5(%arg0: i32) -> (i32, i32) {
    %c0_i32 = arith.constant 0 : i32
    %c0_i32_0 = arith.constant 0 : i32
    return %arg0, %c0_i32 : i32, i32
  }
  func.func @transform_6(%arg0: i32) -> (i32, i32) {
    %c0_i32 = arith.constant 0 : i32
    %c0_i32_0 = arith.constant 0 : i32
    %c0_i32_1 = arith.constant 0 : i32
    return %c0_i32, %c0_i32_0 : i32, i32
  }
}

</mosaic_0001>

<bundles_post_ra>
// kernel: encoder_rnn_forward.1
= control target key start
LH: loop header
LB: loop body
LE: loop exit
PB: predicated region body
PF: predicated region fallthrough
CT: control target
= control target key end

     0   :  { %v2723_v1 = vmov 0   ;;  %v2725_v34 = vmov 0.0   ;;  %vm1995_vm0 = vmmov 0   ;;  %v1996_v53 = vmov 0.0|0.0   ;;  %s2716_s1 = inlined_call_operand.vmem [shape: bf16[128,384], index: 1, kind: input, shape index: {}]   ;;  %s2717_s0 = inlined_call_operand.vmem [shape: bf16[64,128], index: 0, kind: input, shape index: {}]   ;;  %s2718_s2 = inlined_call_operand.vmem [shape: bf16[128,384], index: 2, kind: input, shape index: {}]   ;;  %s2719_s3 = inlined_call_operand.vmem [shape: f32[1,384], index: 3, kind: input, shape index: {}]   ;;  %s2720_s4 = inlined_call_operand.vmem [shape: f32[8,128], index: 4, kind: input, shape index: {}]   ;;  %s2721_s5 = inlined_call_operand.vmem [shape: f32[64,128], index: 5, kind: output, shape index: {0}]   ;;  %s2722_s6 = inlined_call_operand.vmem [shape: f32[8,128], index: 6, kind: output, shape index: {1}]  }
   0x1   :  { %v1823_v0 = vld [vmem:[%s2716_s1 + $0x4] ss:$12 sps:$4 sm:$0xff]   ;;  %269 = vmatprep.mubr.bf16.mxu0 %v2723_v1  ;;  %v1825_v2 = vld [vmem:[%s2716_s1] ss:$12 sps:$4 sm:$0xff]   ;;  %v1826_v3 = vld [vmem:[%s2716_s1 + $0x1c] ss:$12 sps:$4 sm:$0xff]   ;;  %v70_v55 = vlaneseq }
   0x2   :  { %237 = vmatprep.subr.bf16.mxu0 %v1823_v0  ;;  %v1828_v4 = vld [vmem:[%s2716_s1 + $0x18] ss:$12 sps:$4 sm:$0xff]   ;;  %v1829_v5 = vld [vmem:[%s2716_s1 + $0x34] ss:$12 sps:$4 sm:$0xff]   ;;  %v1831_v6 = vld [vmem:[%s2716_s1 + $0x30] ss:$12 sps:$4 sm:$0xff]  }
   0x3   :  { %238 = vmatpush1.bf16.msra.mxu0 %v1825_v2  ;;  %v1832_v7 = vld [vmem:[%s2716_s1 + $0x4c] ss:$12 sps:$4 sm:$0xff]   ;;  %v1843_v8 = vld [vmem:[%s2716_s1 + $0x8] ss:$12 sps:$4 sm:$0xff]   ;;  %v1835_v10 = vld [vmem:[%s2716_s1 + $0x64] ss:$12 sps:$4 sm:$0xff]  }
   0x4   :  { %239 = vmatprep.subr.bf16.mxu0 %v1826_v3  ;;  %v1834_v9 = vld [vmem:[%s2716_s1 + $0x48] ss:$12 sps:$4 sm:$0xff]   ;;  %1635 = vmatprep.subr.bf16.mxu1 %v1843_v8  ;;  %v1847_v11 = vld [vmem:[%s2716_s1 + $0x20] ss:$12 sps:$4 sm:$0xff]   ;;  %v1850_v13 = vld [vmem:[%s2716_s1 + $0x38] ss:$12 sps:$4 sm:$0xff]  }
   0x5   :  { %1636 = vmatpush3.bf16.msra.mxu1 %v1843_v8  ;;  %v1849_v12 = vld [vmem:[%s2717_s0] sm:$0xff]   ;;  %v1838_v15 = vld [vmem:[%s2716_s1 + $0x7c] ss:$12 sps:$4 sm:$0xff]   ;;  %v1845_v21 = vld [vmem:[%s2716_s1 + $0xac] ss:$12 sps:$4 sm:$0xff]   ;;  %v71_v56 = vshrl.u32 %v70_v55, 7 }
   0x6   :  { %1637 = vmatprep.subr.bf16.mxu1 %v1847_v11  ;;  %v1837_v14 = vld [vmem:[%s2716_s1 + $0x60] ss:$12 sps:$4 sm:$0xff]   ;;  %1651 = vmatprep.mubr.bf16.mxu1 %v1849_v12  ;;  %v1854_v16 = vld [vmem:[%s2716_s1 + $0x50] ss:$12 sps:$4 sm:$0xff]   ;;  %v1840_v17 = vld [vmem:[%s2716_s1 + $0x78] ss:$12 sps:$4 sm:$0xff]  }
   0x7   :  { %240 = vmatpush1.bf16.msra.mxu0 %v1828_v4  ;;  %v1841_v18 = vld [vmem:[%s2716_s1 + $0x94] ss:$12 sps:$4 sm:$0xff]   ;;  %v1844_v20 = vld [vmem:[%s2716_s1 + $0x90] ss:$12 sps:$4 sm:$0xff]   ;;  %v1868_v25 = vld [vmem:[%s2716_s1 + $0x98] ss:$12 sps:$4 sm:$0xff]  }
   0x8   :  { %241 = vmatprep.subr.bf16.mxu0 %v1829_v5  ;;  %v1859_v19 = vld [vmem:[%s2716_s1 + $0x68] ss:$12 sps:$4 sm:$0xff]   ;;  %v1863_v22 = vld [vmem:[%s2716_s1 + $0x80] ss:$12 sps:$4 sm:$0xff]   ;;  %v2105_v24 = vld [vmem:[%s2718_s2 + $0x4] ss:$12 sps:$4 sm:$0xff]  }
   0x9   :  { %1638 = vmatpush3.bf16.msra.mxu1 %v1847_v11  ;;  %v1848_v23 = vld [vmem:[%s2716_s1 + $0xa8] ss:$12 sps:$4 sm:$0xff]   ;;  %v2113_v26 = vld [vmem:[%s2718_s2] ss:$12 sps:$4 sm:$0xff]   ;;  %v1872_v28 = vld [vmem:[%s2716_s1 + $0xb0] ss:$12 sps:$4 sm:$0xff]  }
   0xa   :  { %1639 = vmatprep.subr.bf16.mxu1 %v1850_v13  ;;  %v2119_v27 = vld [vmem:[%s2718_s2 + $0x1c] ss:$12 sps:$4 sm:$0xff]   ;;  %v2128_v29 = vld [vmem:[%s2718_s2 + $0x18] ss:$12 sps:$4 sm:$0xff]   ;;  %v2135_v30 = vld [vmem:[%s2718_s2 + $0x34] ss:$12 sps:$4 sm:$0xff]  }
   0xb   :  { %242 = vmatpush1.bf16.msra.mxu0 %v1831_v6  ;;  %v1858_v31 = vld [vmem:[%s2717_s0 + $0x8] sm:$0xff]   ;;  %v2144_v32 = vld [vmem:[%s2718_s2 + $0x30] ss:$12 sps:$4 sm:$0xff]   ;;  %v2197_v42 = vld [vmem:[%s2718_s2 + $0x38] ss:$12 sps:$4 sm:$0xff]   ;;  %v72_v57 = vsub.s32 0, %v71_v56 }
   0xc   :  { %243 = vmatprep.subr.bf16.mxu0 %v1832_v7  ;;  %v2150_v33 = vld [vmem:[%s2718_s2 + $0x4c] ss:$12 sps:$4 sm:$0xff]   ;;  %v2156_v35 = vld [vmem:[%s2718_s2 + $0x8] ss:$12 sps:$4 sm:$0xff]   ;;  %v2172_v38 = vld [vmem:[%s2718_s2 + $0x64] ss:$12 sps:$4 sm:$0xff]  }
   0xd   :  { %1640 = vmatpush3.bf16.msra.mxu1 %v1850_v13  ;;  %v2162_v36 = vld [vmem:[%s2718_s2 + $0x48] ss:$12 sps:$4 sm:$0xff]   ;;  %v2178_v39 = vld [vmem:[%s2718_s2 + $0x20] ss:$12 sps:$4 sm:$0xff]   ;;  %v1876_v43 = vld [vmem:[%s2717_s0 + $0x18] sm:$0xff]   ;;  %v76_v59 = vsub.s32 1, %v71_v56 }
   0xe   :  { %1641 = vmatprep.subr.bf16.mxu1 %v1854_v16  ;;  %v1867_v37 = vld [vmem:[%s2717_s0 + $0x10] sm:$0xff]   ;;  %v2185_v40 = vld [vmem:[%s2718_s2 + $0x60] ss:$12 sps:$4 sm:$0xff]   ;;  %v2191_v41 = vld [vmem:[%s2718_s2 + $0x7c] ss:$12 sps:$4 sm:$0xff]   ;;  %v80_v4 = vsub.s32 2, %v71_v56 }
   0xf   :  { %244 = vmatpush1.bf16.msra.mxu0 %v1834_v9  ;;  %v2207_v44 = vld [vmem:[%s2718_s2 + $0x78] ss:$12 sps:$4 sm:$0xff]   ;;  %v2214_v45 = vld [vmem:[%s2718_s2 + $0x94] ss:$12 sps:$4 sm:$0xff]   ;;  %v2220_v46 = vld [vmem:[%s2718_s2 + $0x50] ss:$12 sps:$4 sm:$0xff]  }
  0x10   :  { %245 = vmatprep.subr.bf16.mxu0 %v1835_v10  ;;  %v2229_v47 = vld [vmem:[%s2718_s2 + $0x90] ss:$12 sps:$4 sm:$0xff]   ;;  %v2235_v48 = vld [vmem:[%s2718_s2 + $0xac] ss:$12 sps:$4 sm:$0xff]   ;;  %v2241_v49 = vld [vmem:[%s2718_s2 + $0x68] ss:$12 sps:$4 sm:$0xff]  }
  0x11   :  { %1642 = vmatpush3.bf16.msra.mxu1 %v1854_v16  ;;  %v2248_v50 = vld [vmem:[%s2718_s2 + $0xa8] ss:$12 sps:$4 sm:$0xff]   ;;  %v2256_v51 = vld [vmem:[%s2718_s2 + $0x80] ss:$12 sps:$4 sm:$0xff]   ;;  %v2265_v52 = vld [vmem:[%s2718_s2 + $0x98] ss:$12 sps:$4 sm:$0xff]  }
  0x12   :  { %1643 = vmatprep.subr.bf16.mxu1 %v1859_v19  ;;  %v2275_v54 = vld [vmem:[%s2718_s2 + $0xb0] ss:$12 sps:$4 sm:$0xff]   ;;  %v68_v58 = vld [vmem:[%s2719_s3] sm:$0x7] }
  0x13   :  { %246 = vmatpush1.bf16.msra.mxu0 %v1837_v14  ;;  %v73_v61 = vrot.slane %v68_v58, %v72_v57  ;;  %v77_v63 = vrot.slane %v68_v58, %v76_v59  ;;  %v2319_v6 = vrot.slane %v68_v58, %v80_v4 }
  0x14   :  { %247 = vmatprep.subr.bf16.mxu0 %v1838_v15 }
  0x15   :  { %1644 = vmatpush3.bf16.msra.mxu1 %v1859_v19 }
  0x16   :  { %1645 = vmatprep.subr.bf16.mxu1 %v1863_v22 }
  0x17   :  { %248 = vmatpush1.bf16.msra.mxu0 %v1840_v17 }
  0x18   :  { %249 = vmatprep.subr.bf16.mxu0 %v1841_v18 }
  0x19   :  { %1646 = vmatpush3.bf16.msra.mxu1 %v1863_v22 }
  0x1a   :  { %1647 = vmatprep.subr.bf16.mxu1 %v1868_v25 }
  0x1b   :  { %250 = vmatpush1.bf16.msra.mxu0 %v1844_v20 }
  0x1c   :  { %251 = vmatprep.subr.bf16.mxu0 %v1845_v21 }
  0x1d   :  { %1648 = vmatpush3.bf16.msra.mxu1 %v1868_v25 }
  0x1e   :  { %1649 = vmatprep.subr.bf16.mxu1 %v1872_v28 }
  0x1f   :  { %252 = vmatpush1.bf16.msra.mxu0 %v1848_v23 }
  0x20   :  { %568 = vmatprep.subr.bf16.mxu0 %v2105_v24 }
  0x21   :  { %1650 = vmatpush3.bf16.msra.mxu1 %v1872_v28 }
  0x22   :  { %270 = vmatmul.mubr.bf16.vlgmr.msra.gmra.mrb[0].mxu0 %v1849_v12  ;;  %1659 = vmatprep.subr.bf16.mxu1 %v2725_v34 }
  0x23   :  { %569 = vmatpush1.bf16.msra.mxu0 %v2113_v26  ;;  %279 = vmatprep.mubr.bf16.mxu0 %v2723_v1 }
  0x24   :  { %570 = vmatprep.subr.bf16.mxu0 %v2119_v27  ;;  %1652 = vmatmul.mubr.bf16.vlgmr.msra.gmra.mrb[0].mxu1 %v1858_v31 }
  0x25   :  { %1660 = vmatpush3.bf16.msra.mxu1 %v2156_v35  ;;  %1655 = vmatprep.mubr.bf16.mxu1 %v1867_v37 }
  0x26   :  { %1661 = vmatprep.subr.bf16.mxu1 %v2725_v34 }
  0x27   :  { %571 = vmatpush1.bf16.msra.mxu0 %v2128_v29 }
  0x28   :  { %572 = vmatprep.subr.bf16.mxu0 %v2135_v30 }
  0x29   :  { %1662 = vmatpush3.bf16.msra.mxu1 %v2178_v39 }
  0x2a   :  { %280 = vmatmul.mubr.bf16.gmra.mrb[4].mxu0 %v1858_v31  ;;  %1663 = vmatprep.subr.bf16.mxu1 %v2725_v34 }
  0x2b   :  { %573 = vmatpush1.bf16.msra.mxu0 %v2144_v32  ;;  %289 = vmatprep.mubr.bf16.mxu0 %v2723_v1 }
  0x2c   :  { %574 = vmatprep.subr.bf16.mxu0 %v2150_v33  ;;  %1656 = vmatmul.mubr.bf16.gmra.mrb[4].mxu1 %v1876_v43 }
  0x2d   :  { %1664 = vmatpush3.bf16.msra.mxu1 %v2197_v42  ;;  %1675 = vmatprep.mubr.msk.bf16.mxu1 %vm1995_vm0, %v2725_v34 }
  0x2e   :  { %1665 = vmatprep.subr.bf16.mxu1 %v2725_v34 }
  0x2f   :  { %575 = vmatpush1.bf16.msra.mxu0 %v2162_v36 }
  0x30   :  { %576 = vmatprep.subr.bf16.mxu0 %v2172_v38 }
  0x31   :  { %1666 = vmatpush3.bf16.msra.mxu1 %v2220_v46 }
  0x32   :  { %290 = vmatmul.mubr.bf16.gmra.mrb[8].mxu0 %v1867_v37  ;;  %1667 = vmatprep.subr.bf16.mxu1 %v2725_v34 }
  0x33   :  { %577 = vmatpush1.bf16.msra.mxu0 %v2185_v40  ;;  %299 = vmatprep.mubr.bf16.mxu0 %v2723_v1 }
  0x34   :  { %578 = vmatprep.subr.bf16.mxu0 %v2191_v41 }
  0x35   :  { %1668 = vmatpush3.bf16.msra.mxu1 %v2241_v49 }
  0x36   :  { %1669 = vmatprep.subr.bf16.mxu1 %v2725_v34 }
  0x37   :  { %579 = vmatpush1.bf16.msra.mxu0 %v2207_v44 }
  0x38   :  { %580 = vmatprep.subr.bf16.mxu0 %v2214_v45 }
  0x39   :  { %1670 = vmatpush3.bf16.msra.mxu1 %v2256_v51 }
  0x3a   :  { %300 = vmatmul.mubr.bf16.gmra.mrb[12].mxu0 %v1876_v43  ;;  %1671 = vmatprep.subr.bf16.mxu1 %v2725_v34 }
  0x3b   :  { %581 = vmatpush1.bf16.msra.mxu0 %v2229_v47  ;;  %600 = vmatprep.mubr.bf16.mxu0 %v2723_v1 }
  0x3c   :  { %582 = vmatprep.subr.bf16.mxu0 %v2235_v48 }
  0x3d   :  { %1672 = vmatpush3.bf16.msra.mxu1 %v2265_v52 }
  0x3e   :  { %1673 = vmatprep.subr.bf16.mxu1 %v2725_v34 }
  0x3f   :  { %583 = vmatpush1.bf16.msra.mxu0 %v2248_v50 }
  0x40   :  { %679 = vmatprep.subr.bf16.mxu0 %v2105_v24 }
  0x41   :  { %1674 = vmatpush3.bf16.msra.mxu1 %v2275_v54 }
  0x42   :  { %601 = vmatmul.mubr.bf16.vlgmr.msra.gmra.mrb[16].mxu0 %v1996_v53  ;;  %1679 = vmatprep.subr.bf16.mxu1 %v2725_v34 }
  0x43   :  { %680 = vmatpush1.bf16.msra.mxu0 %v2113_v26  ;;  %711 = vmatprep.mubr.bf16.mxu0 %v2723_v1 }
  0x44   :  { %681 = vmatprep.subr.bf16.mxu0 %v2119_v27  ;;  %1676 = vmatmul.mubr.bf16.vlgmr.msra.gmra.mrb[8].mxu1 %v1996_v53 }
  0x45   :  { %1680 = vmatpush3.bf16.msra.mxu1 %v2156_v35  ;;  %1695 = vmatprep.mubr.msk.bf16.mxu1 %vm1995_vm0, %v2725_v34 }
  0x46   :  { %1681 = vmatprep.subr.bf16.mxu1 %v2725_v34 }
  0x47   :  { %682 = vmatpush1.bf16.msra.mxu0 %v2128_v29 }
  0x48   :  { %683 = vmatprep.subr.bf16.mxu0 %v2135_v30 }
  0x49   :  { %1682 = vmatpush3.bf16.msra.mxu1 %v2178_v39 }
  0x4a   :  { %1683 = vmatprep.subr.bf16.mxu1 %v2725_v34 }
  0x4b   :  { %684 = vmatpush1.bf16.msra.mxu0 %v2144_v32 }
  0x4c   :  { %685 = vmatprep.subr.bf16.mxu0 %v2150_v33 }
  0x4d   :  { %1684 = vmatpush3.bf16.msra.mxu1 %v2197_v42 }
  0x4e   :  { %1685 = vmatprep.subr.bf16.mxu1 %v2725_v34 }
  0x4f   :  { %686 = vmatpush1.bf16.msra.mxu0 %v2162_v36 }
  0x50   :  { %687 = vmatprep.subr.bf16.mxu0 %v2172_v38 }
  0x51   :  { %1686 = vmatpush3.bf16.msra.mxu1 %v2220_v46 }
  0x52   :  { %1687 = vmatprep.subr.bf16.mxu1 %v2725_v34 }
  0x53   :  { %688 = vmatpush1.bf16.msra.mxu0 %v2185_v40 }
  0x54   :  { %689 = vmatprep.subr.bf16.mxu0 %v2191_v41 }
  0x55   :  { %1688 = vmatpush3.bf16.msra.mxu1 %v2241_v49 }
  0x56   :  { %1689 = vmatprep.subr.bf16.mxu1 %v2725_v34 }
  0x57   :  { %690 = vmatpush1.bf16.msra.mxu0 %v2207_v44 }
  0x58   :  { %691 = vmatprep.subr.bf16.mxu0 %v2214_v45 }
  0x59   :  { %1690 = vmatpush3.bf16.msra.mxu1 %v2256_v51 }
  0x5a   :  { %1691 = vmatprep.subr.bf16.mxu1 %v2725_v34 }
  0x5b   :  { %692 = vmatpush1.bf16.msra.mxu0 %v2229_v47 }
  0x5c   :  { %693 = vmatprep.subr.bf16.mxu0 %v2235_v48 }
  0x5d   :  { %1692 = vmatpush3.bf16.msra.mxu1 %v2265_v52 }
  0x5e   :  { %1693 = vmatprep.subr.bf16.mxu1 %v2725_v34 }
  0x5f   :  { %694 = vmatpush1.bf16.msra.mxu0 %v2248_v50 }
  0x60   :  { %791 = vmatprep.subr.bf16.mxu0 %v2105_v24 }
  0x61   :  { %1694 = vmatpush3.bf16.msra.mxu1 %v2275_v54 }
  0x62   :  { %1699 = vmatprep.subr.bf16.mxu1 %v2725_v34 }
  0xf5   :  { %v271_v60 = vpop.f32.mrb[0].mxu0 }
  0xf6   :  { %v273_v62 = vpop.f32.mrb[1].mxu0 }
  0xf7   :  { %v275_v0 = vpop.f32.mrb[2].mxu0  ;;  %v1653_v12 = vpop.f32.mrb[0].mxu1 }
  0xf8   :  { %v2315_v2 = vadd.f32 %v275_v0, %v73_v61  ;;  %v277_v3 = vpop.f32.mrb[3].mxu0  ;;  %v2328_v15 = vadd.f32 %v1653_v12, %v2319_v6  ;;  %v344_v16 = vpop.f32.mrb[1].mxu1 }
  0xf9   :  { %v2317_v5 = vadd.f32 %v277_v3, %v77_v63  ;;  %v1654_v18 = vpop.f32.mrb[2].mxu1 }
  0xfa   :  { %v2333_v19 = vadd.f32 %v1654_v18, %v2319_v6  ;;  %v347_v20 = vpop.f32.mrb[3].mxu1 }
  0xfb   :  { %v2336_v21 = vadd.f32 %v347_v20, %v2319_v6 }
  0xfd   :  { %v281_v7 = vpop.f32.mrb[4].mxu0 }
  0xfe   :  { %v2321_v8 = vadd.f32 %v281_v7, %v73_v61  ;;  %v283_v9 = vpop.f32.mrb[5].mxu0 }
  0xff   :  { %v2323_v10 = vadd.f32 %v283_v9, %v77_v63  ;;  %v285_v11 = vpop.f32.mrb[6].mxu0  ;;  %v1657_v37 = vpop.f32.mrb[4].mxu1 }
 0x100   :  { %v2325_v13 = vadd.f32 %v285_v11, %v73_v61  ;;  %v287_v14 = vpop.f32.mrb[7].mxu0  ;;  %v2345_v55 = vadd.f32 %v1657_v37, %v2319_v6  ;;  %v360_v56 = vpop.f32.mrb[5].mxu1 }
 0x101   :  { %v2330_v17 = vadd.f32 %v287_v14, %v77_v63  ;;  %v2350_v58 = vadd.f32 %v360_v56, %v2319_v6  ;;  %v1658_v59 = vpop.f32.mrb[6].mxu1 }
 0x102   :  { %2727 = vst [vmem:[#allocation4_spill] sm:$0xff] %v2345_v55  ;;  %v2353_v0 = vadd.f32 %v1658_v59, %v2319_v6  ;;  %v363_v3 = vpop.f32.mrb[7].mxu1 }
 0x103   :  { %v2356_v4 = vadd.f32 %v363_v3, %v2319_v6 }
 0x104   :  { %2728 = vst [vmem:[#allocation5_spill] sm:$0xff] %v2353_v0 }
 0x105   :  { %v291_v22 = vpop.f32.mrb[8].mxu0 }
 0x106   :  { %v2338_v23 = vadd.f32 %v291_v22, %v73_v61  ;;  %v293_v25 = vpop.f32.mrb[9].mxu0 }
 0x107   :  { %v2340_v28 = vadd.f32 %v293_v25, %v77_v63  ;;  %v295_v31 = vpop.f32.mrb[10].mxu0  ;;  %v272_v25 = vadd.f32 %v271_v60, %v73_v61  ;;  %v2369_v60 = vld [vmem:[%s2720_s4] sm:$0xff] }
 0x108   :  { %v2342_v43 = vadd.f32 %v295_v31, %v73_v61  ;;  %v297_v53 = vpop.f32.mrb[11].mxu0  ;;  %v274_v31 = vadd.f32 %v273_v62, %v77_v63 }
 0x109   :  { %v2347_v57 = vadd.f32 %v297_v53, %v77_v63 }
 0x10d   :  { %v301_v7 = vpop.f32.mrb[12].mxu0 }
 0x10e   :  { %v2358_v9 = vadd.f32 %v301_v7, %v73_v61  ;;  %v303_v11 = vpop.f32.mrb[13].mxu0 }
 0x10f   :  { %v2360_v12 = vadd.f32 %v303_v11, %v77_v63  ;;  %v305_v14 = vpop.f32.mrb[14].mxu0 }
 0x110   :  { %v2362_v18 = vadd.f32 %v305_v14, %v73_v61  ;;  %v307_v20 = vpop.f32.mrb[15].mxu0 }
 0x111   :  { %2729 = vst [vmem:[#allocation6_spill] sm:$0xff] %v2360_v12  ;;  %v2364_v22 = vadd.f32 %v307_v20, %v77_v63 }
 0x112   :  { %2730 = vst [vmem:[#allocation7_spill] sm:$0xff] %v2362_v18 }
 0x115   :  { %v602_v37 = vpop.f32.mrb[16].mxu0 }
 0x116   :  { %v649_v53 = vadd.f32 %v602_v37, %v272_v25  ;;  %v604_v56 = vpop.f32.mrb[17].mxu0 }
 0x117   :  { %v656_v59 = vadd.f32 %v604_v56, %v274_v31  ;;  %v606_v3 = vpop.f32.mrb[18].mxu0  ;;  %v643_v0 = vpop.f32.mrb[8].mxu1 }
 0x118   :  { %v1528_v1 = vmul.f32 -1.442695, %v649_v53  ;;  %v607_v34 = vpop.f32.mrb[19].mxu0  ;;  %v1677_v11 = vpop.f32.mrb[9].mxu1  ;;  %v663_v62 = vadd.f32 %v643_v0, %v2369_v60 }
 0x119   :  { %v1529_v7 = vmul.f32 -1.442695, %v656_v59  ;;  %v646_v55 = vpop.f32.mrb[10].mxu1 }
 0x11a   :  { %1891 = vpow2.f32 %v1528_v1  ;;  %v1678_v14 = vpop.f32.mrb[11].mxu1  ;;  %v345_v1 = vadd.f32 %v344_v16, %v2319_v6  ;;  %v2731_v6 = vmov 0.0   ;;  %v2732_v16 = vmov 0  }
 0x11b   :  { %1893 = vpow2.f32 %v1529_v7 }
 0x124   :  { %v1892_v18 = vpop.eup %1891 }
 0x125   :  { %v653_v12 = vadd.f32 1.0, %v1892_v18  ;;  %v1894_v20 = vpop.eup %1893 }
 0x126   :  { %v660_v61 = vadd.f32 1.0, %v1894_v20 }
 0x127   :  { %1895 = vrcp.f32 %v653_v12 }
 0x128   :  { %1897 = vrcp.f32 %v660_v61 }
 0x131   :  { %v1896_v34 = vpop.eup %1895 }
 0x132   :  { %v664_v63 = vmul.f32 %v1896_v34, %v663_v62  ;;  %v1898_v55 = vpop.eup %1897 }
 0x133   :  { %v667_v31 = vsub.f32 1.0, %v1898_v55  ;;  %v669_v37 = vmul.f32 0.0, %v1898_v55 }
 0x134   :  { %v665_v25 = vadd.f32 %v664_v63, %v345_v1 }
 0x136   :  { %1899 = vtanh.f32 %v665_v25 }
 0x140   :  { %v1900_v18 = vpop.eup %1899 }
 0x141   :  { %v668_v12 = vmul.f32 %v1900_v18, %v667_v31 }
 0x143   :  { %v2373_v53 = vadd.f32 %v669_v37, %v668_v12 }
 0x145   :  { %671 = vst [vmem:[%s2721_s5] sm:$0xff] %v2373_v53  ;;  %v678_v0 = vpack.c.bf16 %v2373_v53, %v2373_v53 }
 0x147   :  { %712 = vmatmul.mubr.bf16.vlgmr.msra.gmra.mrb[20].mxu0 %v678_v0  ;;  %1696 = vmatmul.mubr.bf16.vlgmr.msra.gmra.mrb[12].mxu1 %v678_v0 }
 0x148   :  { %792 = vmatpush1.bf16.msra.mxu0 %v2113_v26  ;;  %1700 = vmatpush3.bf16.msra.mxu1 %v2156_v35 }
 0x149   :  { %793 = vmatprep.subr.bf16.mxu0 %v2119_v27  ;;  %1701 = vmatprep.subr.bf16.mxu1 %v2731_v6 }
 0x14a   :  { %823 = vmatprep.mubr.bf16.mxu0 %v2732_v16  ;;  %1715 = vmatprep.mubr.msk.bf16.mxu1 %vm1995_vm0, %v2731_v6 }
 0x14c   :  { %794 = vmatpush1.bf16.msra.mxu0 %v2128_v29  ;;  %1702 = vmatpush3.bf16.msra.mxu1 %v2178_v39 }
 0x14d   :  { %795 = vmatprep.subr.bf16.mxu0 %v2135_v30  ;;  %1703 = vmatprep.subr.bf16.mxu1 %v2731_v6 }
 0x150   :  { %796 = vmatpush1.bf16.msra.mxu0 %v2144_v32  ;;  %1704 = vmatpush3.bf16.msra.mxu1 %v2197_v42 }
 0x151   :  { %797 = vmatprep.subr.bf16.mxu0 %v2150_v33  ;;  %1705 = vmatprep.subr.bf16.mxu1 %v2731_v6 }
 0x154   :  { %798 = vmatpush1.bf16.msra.mxu0 %v2162_v36  ;;  %1706 = vmatpush3.bf16.msra.mxu1 %v2220_v46 }
 0x155   :  { %799 = vmatprep.subr.bf16.mxu0 %v2172_v38  ;;  %1707 = vmatprep.subr.bf16.mxu1 %v2731_v6 }
 0x158   :  { %800 = vmatpush1.bf16.msra.mxu0 %v2185_v40  ;;  %1708 = vmatpush3.bf16.msra.mxu1 %v2241_v49 }
 0x159   :  { %801 = vmatprep.subr.bf16.mxu0 %v2191_v41  ;;  %1709 = vmatprep.subr.bf16.mxu1 %v2731_v6 }
 0x15c   :  { %802 = vmatpush1.bf16.msra.mxu0 %v2207_v44  ;;  %1710 = vmatpush3.bf16.msra.mxu1 %v2256_v51 }
 0x15d   :  { %803 = vmatprep.subr.bf16.mxu0 %v2214_v45  ;;  %1711 = vmatprep.subr.bf16.mxu1 %v2731_v6 }
 0x160   :  { %804 = vmatpush1.bf16.msra.mxu0 %v2229_v47  ;;  %1712 = vmatpush3.bf16.msra.mxu1 %v2265_v52 }
 0x161   :  { %805 = vmatprep.subr.bf16.mxu0 %v2235_v48  ;;  %1713 = vmatprep.subr.bf16.mxu1 %v2731_v6 }
 0x164   :  { %806 = vmatpush1.bf16.msra.mxu0 %v2248_v50  ;;  %1714 = vmatpush3.bf16.msra.mxu1 %v2275_v54 }
 0x165   :  { %903 = vmatprep.subr.bf16.mxu0 %v2105_v24  ;;  %1719 = vmatprep.subr.bf16.mxu1 %v2731_v6 }
 0x21a   :  { %v713_v56 = vpop.f32.mrb[20].mxu0  ;;  %v754_v59 = vpop.f32.mrb[12].mxu1 }
 0x21b   :  { %v760_v3 = vadd.f32 %v713_v56, %v2315_v2  ;;  %v715_v7 = vpop.f32.mrb[21].mxu0  ;;  %v1697_v11 = vpop.f32.mrb[13].mxu1  ;;  %v774_v12 = vadd.f32 %v754_v59, %v2369_v60 }
 0x21c   :  { %v767_v14 = vadd.f32 %v715_v7, %v2317_v5  ;;  %v717_v20 = vpop.f32.mrb[22].mxu0  ;;  %v757_v61 = vpop.f32.mrb[14].mxu1 }
 0x21d   :  { %v1530_v62 = vmul.f32 -1.442695, %v760_v3  ;;  %v718_v34 = vpop.f32.mrb[23].mxu0  ;;  %v1698_v1 = vpop.f32.mrb[15].mxu1 }
 0x21e   :  { %v1531_v63 = vmul.f32 -1.442695, %v767_v14 }
 0x21f   :  { %1901 = vpow2.f32 %v1530_v62 }
 0x220   :  { %1903 = vpow2.f32 %v1531_v63 }
 0x229   :  { %v1902_v25 = vpop.eup %1901 }
 0x22a   :  { %v764_v55 = vadd.f32 1.0, %v1902_v25  ;;  %v1904_v31 = vpop.eup %1903 }
 0x22b   :  { %v771_v18 = vadd.f32 1.0, %v1904_v31 }
 0x22c   :  { %1905 = vrcp.f32 %v764_v55 }
 0x22d   :  { %1907 = vrcp.f32 %v771_v18 }
 0x236   :  { %v1906_v2 = vpop.eup %1905 }
 0x237   :  { %v775_v37 = vmul.f32 %v1906_v2, %v774_v12  ;;  %v1908_v0 = vpop.eup %1907 }
 0x238   :  { %v778_v56 = vsub.f32 1.0, %v1908_v0  ;;  %v780_v11 = vmul.f32 %v1908_v0, %v2373_v53 }
 0x239   :  { %v776_v5 = vadd.f32 %v775_v37, %v2336_v21 }
 0x23b   :  { %1909 = vtanh.f32 %v776_v5 }
 0x245   :  { %v1910_v3 = vpop.eup %1909 }
 0x246   :  { %v779_v7 = vmul.f32 %v1910_v3, %v778_v56 }
 0x248   :  { %v2421_v14 = vadd.f32 %v780_v11, %v779_v7 }
 0x24a   :  { %1532 = vst [vmem:[%s2721_s5 + $0x8] sm:$0xff] %v2421_v14  ;;  %v790_v59 = vpack.c.bf16 %v2421_v14, %v2421_v14 }
 0x24c   :  { %824 = vmatmul.mubr.bf16.vlgmr.msra.gmra.mrb[24].mxu0 %v790_v59  ;;  %1716 = vmatmul.mubr.bf16.vlgmr.msra.gmra.mrb[16].mxu1 %v790_v59 }
 0x24d   :  { %904 = vmatpush1.bf16.msra.mxu0 %v2113_v26  ;;  %1720 = vmatpush3.bf16.msra.mxu1 %v2156_v35 }
 0x24e   :  { %905 = vmatprep.subr.bf16.mxu0 %v2119_v27  ;;  %1721 = vmatprep.subr.bf16.mxu1 %v2731_v6 }
 0x24f   :  { %935 = vmatprep.mubr.bf16.mxu0 %v2732_v16  ;;  %1735 = vmatprep.mubr.msk.bf16.mxu1 %vm1995_vm0, %v2731_v6 }
 0x251   :  { %906 = vmatpush1.bf16.msra.mxu0 %v2128_v29  ;;  %1722 = vmatpush3.bf16.msra.mxu1 %v2178_v39 }
 0x252   :  { %907 = vmatprep.subr.bf16.mxu0 %v2135_v30  ;;  %1723 = vmatprep.subr.bf16.mxu1 %v2731_v6 }
 0x255   :  { %908 = vmatpush1.bf16.msra.mxu0 %v2144_v32  ;;  %1724 = vmatpush3.bf16.msra.mxu1 %v2197_v42 }
 0x256   :  { %909 = vmatprep.subr.bf16.mxu0 %v2150_v33  ;;  %1725 = vmatprep.subr.bf16.mxu1 %v2731_v6 }
 0x259   :  { %910 = vmatpush1.bf16.msra.mxu0 %v2162_v36  ;;  %1726 = vmatpush3.bf16.msra.mxu1 %v2220_v46 }
 0x25a   :  { %911 = vmatprep.subr.bf16.mxu0 %v2172_v38  ;;  %1727 = vmatprep.subr.bf16.mxu1 %v2731_v6 }
 0x25d   :  { %912 = vmatpush1.bf16.msra.mxu0 %v2185_v40  ;;  %1728 = vmatpush3.bf16.msra.mxu1 %v2241_v49 }
 0x25e   :  { %913 = vmatprep.subr.bf16.mxu0 %v2191_v41  ;;  %1729 = vmatprep.subr.bf16.mxu1 %v2731_v6 }
 0x261   :  { %914 = vmatpush1.bf16.msra.mxu0 %v2207_v44  ;;  %1730 = vmatpush3.bf16.msra.mxu1 %v2256_v51 }
 0x262   :  { %915 = vmatprep.subr.bf16.mxu0 %v2214_v45  ;;  %1731 = vmatprep.subr.bf16.mxu1 %v2731_v6 }
 0x265   :  { %916 = vmatpush1.bf16.msra.mxu0 %v2229_v47  ;;  %1732 = vmatpush3.bf16.msra.mxu1 %v2265_v52 }
 0x266   :  { %917 = vmatprep.subr.bf16.mxu0 %v2235_v48  ;;  %1733 = vmatprep.subr.bf16.mxu1 %v2731_v6 }
 0x269   :  { %918 = vmatpush1.bf16.msra.mxu0 %v2248_v50  ;;  %1734 = vmatpush3.bf16.msra.mxu1 %v2275_v54 }
 0x26a   :  { %1015 = vmatprep.subr.bf16.mxu0 %v2105_v24  ;;  %1739 = vmatprep.subr.bf16.mxu1 %v2731_v6 }
 0x31f   :  { %v825_v21 = vpop.f32.mrb[24].mxu0  ;;  %v866_v53 = vpop.f32.mrb[16].mxu1 }
 0x320   :  { %v872_v20 = vadd.f32 %v825_v21, %v2321_v8  ;;  %v827_v61 = vpop.f32.mrb[25].mxu0  ;;  %v1717_v62 = vpop.f32.mrb[17].mxu1  ;;  %v886_v0 = vadd.f32 %v866_v53, %v2369_v60 }
 0x321   :  { %v879_v34 = vadd.f32 %v827_v61, %v2323_v10  ;;  %v829_v1 = vpop.f32.mrb[26].mxu0  ;;  %v869_v63 = vpop.f32.mrb[18].mxu1 }
 0x322   :  { %v1533_v25 = vmul.f32 -1.442695, %v872_v20  ;;  %v830_v55 = vpop.f32.mrb[27].mxu0  ;;  %v1718_v31 = vpop.f32.mrb[19].mxu1 }
 0x323   :  { %v1534_v18 = vmul.f32 -1.442695, %v879_v34 }
 0x324   :  { %1911 = vpow2.f32 %v1533_v25 }
 0x325   :  { %1913 = vpow2.f32 %v1534_v18 }
 0x32e   :  { %v1912_v12 = vpop.eup %1911 }
 0x32f   :  { %v876_v2 = vadd.f32 1.0, %v1912_v12  ;;  %v1914_v37 = vpop.eup %1913 }
 0x330   :  { %v883_v5 = vadd.f32 1.0, %v1914_v37 }
 0x331   :  { %1915 = vrcp.f32 %v876_v2 }
 0x332   :  { %1917 = vrcp.f32 %v883_v5 }
 0x33b   :  { %v1916_v8 = vpop.eup %1915 }
 0x33c   :  { %v887_v56 = vmul.f32 %v1916_v8, %v886_v0  ;;  %v1918_v3 = vpop.eup %1917 }
 0x33d   :  { %v890_v7 = vsub.f32 1.0, %v1918_v3  ;;  %v892_v21 = vmul.f32 %v1918_v3, %v2421_v14 }
 0x33e   :  { %v888_v10 = vadd.f32 %v887_v56, %v2328_v15 }
 0x340   :  { %1919 = vtanh.f32 %v888_v10 }
 0x34a   :  { %v1920_v11 = vpop.eup %1919 }
 0x34b   :  { %v891_v59 = vmul.f32 %v1920_v11, %v890_v7 }
 0x34d   :  { %v2469_v20 = vadd.f32 %v892_v21, %v891_v59 }
 0x34f   :  { %1535 = vst [vmem:[%s2721_s5 + $0x10] sm:$0xff] %v2469_v20  ;;  %v902_v53 = vpack.c.bf16 %v2469_v20, %v2469_v20 }
 0x351   :  { %936 = vmatmul.mubr.bf16.vlgmr.msra.gmra.mrb[28].mxu0 %v902_v53  ;;  %1736 = vmatmul.mubr.bf16.vlgmr.msra.gmra.mrb[20].mxu1 %v902_v53 }
 0x352   :  { %1016 = vmatpush1.bf16.msra.mxu0 %v2113_v26  ;;  %1740 = vmatpush3.bf16.msra.mxu1 %v2156_v35 }
 0x353   :  { %1017 = vmatprep.subr.bf16.mxu0 %v2119_v27  ;;  %1741 = vmatprep.subr.bf16.mxu1 %v2731_v6 }
 0x354   :  { %1047 = vmatprep.mubr.bf16.mxu0 %v2732_v16  ;;  %1755 = vmatprep.mubr.msk.bf16.mxu1 %vm1995_vm0, %v2731_v6 }
 0x356   :  { %1018 = vmatpush1.bf16.msra.mxu0 %v2128_v29  ;;  %1742 = vmatpush3.bf16.msra.mxu1 %v2178_v39 }
 0x357   :  { %1019 = vmatprep.subr.bf16.mxu0 %v2135_v30  ;;  %1743 = vmatprep.subr.bf16.mxu1 %v2731_v6 }
 0x35a   :  { %1020 = vmatpush1.bf16.msra.mxu0 %v2144_v32  ;;  %1744 = vmatpush3.bf16.msra.mxu1 %v2197_v42 }
 0x35b   :  { %1021 = vmatprep.subr.bf16.mxu0 %v2150_v33  ;;  %1745 = vmatprep.subr.bf16.mxu1 %v2731_v6 }
 0x35e   :  { %1022 = vmatpush1.bf16.msra.mxu0 %v2162_v36  ;;  %1746 = vmatpush3.bf16.msra.mxu1 %v2220_v46 }
 0x35f   :  { %1023 = vmatprep.subr.bf16.mxu0 %v2172_v38  ;;  %1747 = vmatprep.subr.bf16.mxu1 %v2731_v6 }
 0x362   :  { %1024 = vmatpush1.bf16.msra.mxu0 %v2185_v40  ;;  %1748 = vmatpush3.bf16.msra.mxu1 %v2241_v49 }
 0x363   :  { %1025 = vmatprep.subr.bf16.mxu0 %v2191_v41  ;;  %1749 = vmatprep.subr.bf16.mxu1 %v2731_v6 }
 0x366   :  { %1026 = vmatpush1.bf16.msra.mxu0 %v2207_v44  ;;  %1750 = vmatpush3.bf16.msra.mxu1 %v2256_v51 }
 0x367   :  { %1027 = vmatprep.subr.bf16.mxu0 %v2214_v45  ;;  %1751 = vmatprep.subr.bf16.mxu1 %v2731_v6 }
 0x36a   :  { %1028 = vmatpush1.bf16.msra.mxu0 %v2229_v47  ;;  %1752 = vmatpush3.bf16.msra.mxu1 %v2265_v52 }
 0x36b   :  { %1029 = vmatprep.subr.bf16.mxu0 %v2235_v48  ;;  %1753 = vmatprep.subr.bf16.mxu1 %v2731_v6 }
 0x36e   :  { %1030 = vmatpush1.bf16.msra.mxu0 %v2248_v50  ;;  %1754 = vmatpush3.bf16.msra.mxu1 %v2275_v54 }
 0x36f   :  { %1127 = vmatprep.subr.bf16.mxu0 %v2105_v24  ;;  %1759 = vmatprep.subr.bf16.mxu1 %v2731_v6 }
 0x424   :  { %v937_v15 = vpop.f32.mrb[28].mxu0  ;;  %v978_v14 = vpop.f32.mrb[20].mxu1 }
 0x425   :  { %v984_v61 = vadd.f32 %v937_v15, %v2325_v13  ;;  %v939_v62 = vpop.f32.mrb[29].mxu0  ;;  %v1737_v34 = vpop.f32.mrb[21].mxu1  ;;  %v998_v8 = vadd.f32 %v978_v14, %v2369_v60 }
 0x426   :  { %v991_v1 = vadd.f32 %v939_v62, %v2330_v17  ;;  %v941_v63 = vpop.f32.mrb[30].mxu0  ;;  %v981_v25 = vpop.f32.mrb[22].mxu1 }
 0x427   :  { %v1536_v55 = vmul.f32 -1.442695, %v984_v61  ;;  %v942_v31 = vpop.f32.mrb[31].mxu0  ;;  %v1738_v18 = vpop.f32.mrb[23].mxu1 }
 0x428   :  { %v1537_v12 = vmul.f32 -1.442695, %v991_v1 }
 0x429   :  { %1921 = vpow2.f32 %v1536_v55 }
 0x42a   :  { %1923 = vpow2.f32 %v1537_v12 }
 0x433   :  { %v1922_v2 = vpop.eup %1921 }
 0x434   :  { %v988_v37 = vadd.f32 1.0, %v1922_v2  ;;  %v1924_v5 = vpop.eup %1923 }
 0x435   :  { %v995_v0 = vadd.f32 1.0, %v1924_v5 }
 0x436   :  { %1925 = vrcp.f32 %v988_v37 }
 0x437   :  { %1927 = vrcp.f32 %v995_v0 }
 0x440   :  { %v1926_v13 = vpop.eup %1925 }
 0x441   :  { %v999_v56 = vmul.f32 %v1926_v13, %v998_v8  ;;  %v1928_v10 = vpop.eup %1927 }
 0x442   :  { %v1002_v3 = vsub.f32 1.0, %v1928_v10  ;;  %v1004_v59 = vmul.f32 %v1928_v10, %v2469_v20 }
 0x443   :  { %v1000_v17 = vadd.f32 %v999_v56, %v2333_v19 }
 0x445   :  { %1929 = vtanh.f32 %v1000_v17 }
 0x44f   :  { %v1930_v7 = vpop.eup %1929 }
 0x450   :  { %v1003_v11 = vmul.f32 %v1930_v7, %v1002_v3 }
 0x452   :  { %v2517_v21 = vadd.f32 %v1004_v59, %v1003_v11 }
 0x454   :  { %1538 = vst [vmem:[%s2721_s5 + $0x18] sm:$0xff] %v2517_v21  ;;  %v1014_v53 = vpack.c.bf16 %v2517_v21, %v2517_v21 }
 0x456   :  { %1048 = vmatmul.mubr.bf16.vlgmr.msra.gmra.mrb[32].mxu0 %v1014_v53  ;;  %1756 = vmatmul.mubr.bf16.vlgmr.msra.gmra.mrb[24].mxu1 %v1014_v53  ;;  %v1973_v53 = vld [vmem:[%s2718_s2 + $0x8] ss:$12 sps:$4 sm:$0xff]  }
 0x457   :  { %1128 = vmatpush1.bf16.msra.mxu0 %v2113_v26  ;;  %1760 = vmatpush3.bf16.msra.mxu1 %v2156_v35 }
 0x458   :  { %1129 = vmatprep.subr.bf16.mxu0 %v2119_v27  ;;  %1761 = vmatprep.subr.bf16.mxu1 %v2731_v6 }
 0x459   :  { %1159 = vmatprep.mubr.bf16.mxu0 %v2732_v16  ;;  %1775 = vmatprep.mubr.msk.bf16.mxu1 %vm1995_vm0, %v2731_v6 }
 0x45b   :  { %1130 = vmatpush1.bf16.msra.mxu0 %v2128_v29  ;;  %1762 = vmatpush3.bf16.msra.mxu1 %v2178_v39 }
 0x45c   :  { %1131 = vmatprep.subr.bf16.mxu0 %v2135_v30  ;;  %1763 = vmatprep.subr.bf16.mxu1 %v2731_v6 }
 0x45f   :  { %1132 = vmatpush1.bf16.msra.mxu0 %v2144_v32  ;;  %1764 = vmatpush3.bf16.msra.mxu1 %v2197_v42 }
 0x460   :  { %1133 = vmatprep.subr.bf16.mxu0 %v2150_v33  ;;  %1765 = vmatprep.subr.bf16.mxu1 %v2731_v6 }
 0x463   :  { %1134 = vmatpush1.bf16.msra.mxu0 %v2162_v36  ;;  %1766 = vmatpush3.bf16.msra.mxu1 %v2220_v46 }
 0x464   :  { %1135 = vmatprep.subr.bf16.mxu0 %v2172_v38  ;;  %1767 = vmatprep.subr.bf16.mxu1 %v2731_v6 }
 0x467   :  { %1136 = vmatpush1.bf16.msra.mxu0 %v2185_v40  ;;  %1768 = vmatpush3.bf16.msra.mxu1 %v2241_v49 }
 0x468   :  { %1137 = vmatprep.subr.bf16.mxu0 %v2191_v41  ;;  %1769 = vmatprep.subr.bf16.mxu1 %v2731_v6 }
 0x46b   :  { %1138 = vmatpush1.bf16.msra.mxu0 %v2207_v44  ;;  %1770 = vmatpush3.bf16.msra.mxu1 %v2256_v51 }
 0x46c   :  { %1139 = vmatprep.subr.bf16.mxu0 %v2214_v45  ;;  %1771 = vmatprep.subr.bf16.mxu1 %v2731_v6 }
 0x46f   :  { %1140 = vmatpush1.bf16.msra.mxu0 %v2229_v47  ;;  %1772 = vmatpush3.bf16.msra.mxu1 %v2265_v52 }
 0x470   :  { %1141 = vmatprep.subr.bf16.mxu0 %v2235_v48  ;;  %1773 = vmatprep.subr.bf16.mxu1 %v2731_v6 }
 0x473   :  { %1142 = vmatpush1.bf16.msra.mxu0 %v2248_v50  ;;  %1774 = vmatpush3.bf16.msra.mxu1 %v2275_v54 }
 0x474   :  { %1239 = vmatprep.subr.bf16.mxu0 %v2105_v24  ;;  %1779 = vmatprep.subr.bf16.mxu1 %v2731_v6 }
 0x529   :  { %v1049_v19 = vpop.f32.mrb[32].mxu0  ;;  %v1090_v20 = vpop.f32.mrb[24].mxu1 }
 0x52a   :  { %v1096_v15 = vadd.f32 %v1049_v19, %v2338_v23  ;;  %v1051_v14 = vpop.f32.mrb[33].mxu0  ;;  %v1757_v61 = vpop.f32.mrb[25].mxu1  ;;  %v1110_v37 = vadd.f32 %v1090_v20, %v2369_v60  ;;  %v1974_v19 = vld [vmem:[%s2718_s2 + $0x1c] ss:$12 sps:$4 sm:$0xff]   ;;  %v1975_v20 = vld [vmem:[%s2718_s2 + $0x18] ss:$12 sps:$4 sm:$0xff]  }
 0x52b   :  { %v1103_v62 = vadd.f32 %v1051_v14, %v2340_v28  ;;  %v1053_v34 = vpop.f32.mrb[34].mxu0  ;;  %v1093_v1 = vpop.f32.mrb[26].mxu1  ;;  %v1977_v14 = vld [vmem:[%s2718_s2 + $0x34] ss:$12 sps:$4 sm:$0xff]   ;;  %v1979_v61 = vld [vmem:[%s2718_s2 + $0x38] ss:$12 sps:$4 sm:$0xff]  }
 0x52c   :  { %v1539_v63 = vmul.f32 -1.442695, %v1096_v15  ;;  %v1054_v25 = vpop.f32.mrb[35].mxu0  ;;  %v1758_v55 = vpop.f32.mrb[27].mxu1  ;;  %v1976_v15 = vld [vmem:[%s2718_s2 + $0x20] ss:$12 sps:$4 sm:$0xff]  }
 0x52d   :  { %v1540_v31 = vmul.f32 -1.442695, %v1103_v62  ;;  %v1980_v62 = vld [vmem:[%s2718_s2 + $0x4c] ss:$12 sps:$4 sm:$0xff]   ;;  %v1981_v34 = vld [vmem:[%s2718_s2 + $0x48] ss:$12 sps:$4 sm:$0xff]  }
 0x52e   :  { %1931 = vpow2.f32 %v1539_v63  ;;  %v1982_v1 = vld [vmem:[%s2718_s2 + $0x50] ss:$12 sps:$4 sm:$0xff]   ;;  %v1984_v25 = vld [vmem:[%s2718_s2 + $0x60] ss:$12 sps:$4 sm:$0xff]   ;;  %v1985_v55 = vld [vmem:[%s2718_s2 + $0x68] ss:$12 sps:$4 sm:$0xff]  }
 0x52f   :  { %1933 = vpow2.f32 %v1540_v31  ;;  %v1983_v63 = vld [vmem:[%s2718_s2 + $0x64] ss:$12 sps:$4 sm:$0xff]   ;;  %v1986_v31 = vld [vmem:[%s2718_s2 + $0x7c] ss:$12 sps:$4 sm:$0xff]  }
 0x538   :  { %v1932_v18 = vpop.eup %1931 }
 0x539   :  { %v1100_v24 = vadd.f32 1.0, %v1932_v18  ;;  %v1934_v12 = vpop.eup %1933  ;;  %v1987_v18 = vld [vmem:[%s2718_s2 + $0x78] ss:$12 sps:$4 sm:$0xff]  }
 0x53a   :  { %v1107_v2 = vadd.f32 1.0, %v1934_v12  ;;  %v1989_v12 = vld [vmem:[%s2718_s2 + $0x94] ss:$12 sps:$4 sm:$0xff]  }
 0x53b   :  { %1935 = vrcp.f32 %v1100_v24  ;;  %v1988_v24 = vld [vmem:[%s2718_s2 + $0x80] ss:$12 sps:$4 sm:$0xff]  }
 0x53c   :  { %1937 = vrcp.f32 %v1107_v2  ;;  %v1990_v2 = vld [vmem:[%s2718_s2 + $0x90] ss:$12 sps:$4 sm:$0xff]  }
 0x545   :  { %v1936_v23 = vpop.eup %1935 }
 0x546   :  { %v1111_v5 = vmul.f32 %v1936_v23, %v1110_v37  ;;  %v1938_v0 = vpop.eup %1937  ;;  %v1991_v37 = vld [vmem:[%s2718_s2 + $0xac] ss:$12 sps:$4 sm:$0xff]   ;;  %v1992_v23 = vld [vmem:[%s2718_s2 + $0xa8] ss:$12 sps:$4 sm:$0xff]  }
 0x547   :  { %v1114_v8 = vsub.f32 1.0, %v1938_v0  ;;  %v1116_v17 = vmul.f32 %v1938_v0, %v2517_v21 }
 0x548   :  { %v1112_v28 = vadd.f32 %v1111_v5, %v2350_v58 }
 0x54a   :  { %1939 = vtanh.f32 %v1112_v28 }
 0x554   :  { %v1940_v13 = vpop.eup %1939 }
 0x555   :  { %v1115_v56 = vmul.f32 %v1940_v13, %v1114_v8  ;;  %v2733_v13 = vld [vmem:[#allocation6_spill] sm:$0xff] }
 0x557   :  { %v2565_v10 = vadd.f32 %v1116_v17, %v1115_v56 }
 0x559   :  { %1541 = vst [vmem:[%s2721_s5 + $0x20] sm:$0xff] %v2565_v10  ;;  %v1126_v3 = vpack.c.bf16 %v2565_v10, %v2565_v10 }
 0x55b   :  { %1160 = vmatmul.mubr.bf16.vlgmr.msra.gmra.mrb[36].mxu0 %v1126_v3  ;;  %1776 = vmatmul.mubr.bf16.vlgmr.msra.gmra.mrb[28].mxu1 %v1126_v3 }
 0x55c   :  { %1240 = vmatpush1.bf16.msra.mxu0 %v2113_v26  ;;  %1780 = vmatpush3.bf16.msra.mxu1 %v2156_v35  ;;  %v1971_v26 = vld [vmem:[%s2718_s2 + $0x4] ss:$12 sps:$4 sm:$0xff]  }
 0x55d   :  { %1241 = vmatprep.subr.bf16.mxu0 %v2119_v27  ;;  %1781 = vmatprep.subr.bf16.mxu1 %v2731_v6 }
 0x55e   :  { %1271 = vmatprep.mubr.bf16.mxu0 %v2732_v16  ;;  %1795 = vmatprep.mubr.msk.bf16.mxu1 %vm1995_vm0, %v2731_v6 }
 0x560   :  { %1242 = vmatpush1.bf16.msra.mxu0 %v2128_v29  ;;  %1782 = vmatpush3.bf16.msra.mxu1 %v2178_v39 }
 0x561   :  { %1243 = vmatprep.subr.bf16.mxu0 %v2135_v30  ;;  %1783 = vmatprep.subr.bf16.mxu1 %v2731_v6 }
 0x564   :  { %1244 = vmatpush1.bf16.msra.mxu0 %v2144_v32  ;;  %1784 = vmatpush3.bf16.msra.mxu1 %v2197_v42 }
 0x565   :  { %1245 = vmatprep.subr.bf16.mxu0 %v2150_v33  ;;  %1785 = vmatprep.subr.bf16.mxu1 %v2731_v6 }
 0x568   :  { %1246 = vmatpush1.bf16.msra.mxu0 %v2162_v36  ;;  %1786 = vmatpush3.bf16.msra.mxu1 %v2220_v46 }
 0x569   :  { %1247 = vmatprep.subr.bf16.mxu0 %v2172_v38  ;;  %1787 = vmatprep.subr.bf16.mxu1 %v2731_v6 }
 0x56c   :  { %1248 = vmatpush1.bf16.msra.mxu0 %v2185_v40  ;;  %1788 = vmatpush3.bf16.msra.mxu1 %v2241_v49 }
 0x56d   :  { %1249 = vmatprep.subr.bf16.mxu0 %v2191_v41  ;;  %1789 = vmatprep.subr.bf16.mxu1 %v2731_v6 }
 0x570   :  { %1250 = vmatpush1.bf16.msra.mxu0 %v2207_v44  ;;  %1790 = vmatpush3.bf16.msra.mxu1 %v2256_v51 }
 0x571   :  { %1251 = vmatprep.subr.bf16.mxu0 %v2214_v45  ;;  %1791 = vmatprep.subr.bf16.mxu1 %v2731_v6 }
 0x574   :  { %1252 = vmatpush1.bf16.msra.mxu0 %v2229_v47  ;;  %1792 = vmatpush3.bf16.msra.mxu1 %v2265_v52 }
 0x575   :  { %1253 = vmatprep.subr.bf16.mxu0 %v2235_v48  ;;  %1793 = vmatprep.subr.bf16.mxu1 %v2731_v6 }
 0x578   :  { %1254 = vmatpush1.bf16.msra.mxu0 %v2248_v50  ;;  %1794 = vmatpush3.bf16.msra.mxu1 %v2275_v54 }
 0x579   :  { %1351 = vmatprep.subr.bf16.mxu0 %v1971_v26  ;;  %1799 = vmatprep.subr.bf16.mxu1 %v2731_v6 }
 0x62e   :  { %v1161_v27 = vpop.f32.mrb[36].mxu0  ;;  %v1202_v29 = vpop.f32.mrb[28].mxu1 }
 0x62f   :  { %v1208_v30 = vadd.f32 %v1161_v27, %v2342_v43  ;;  %v1163_v32 = vpop.f32.mrb[37].mxu0  ;;  %v1777_v33 = vpop.f32.mrb[29].mxu1  ;;  %v1222_v48 = vadd.f32 %v1202_v29, %v2369_v60 }
 0x630   :  { %v1215_v35 = vadd.f32 %v1163_v32, %v2347_v57  ;;  %v1165_v36 = vpop.f32.mrb[38].mxu0  ;;  %v1205_v38 = vpop.f32.mrb[30].mxu1 }
 0x631   :  { %v1542_v39 = vmul.f32 -1.442695, %v1208_v30  ;;  %v1166_v40 = vpop.f32.mrb[39].mxu0  ;;  %v1778_v41 = vpop.f32.mrb[31].mxu1  ;;  %v2734_v36 = vld [vmem:[#allocation4_spill] sm:$0xff] }
 0x632   :  { %v1543_v42 = vmul.f32 -1.442695, %v1215_v35 }
 0x633   :  { %1941 = vpow2.f32 %v1542_v39 }
 0x634   :  { %1943 = vpow2.f32 %v1543_v42 }
 0x63d   :  { %v1942_v44 = vpop.eup %1941 }
 0x63e   :  { %v1212_v45 = vadd.f32 1.0, %v1942_v44  ;;  %v1944_v46 = vpop.eup %1943 }
 0x63f   :  { %v1219_v47 = vadd.f32 1.0, %v1944_v46 }
 0x640   :  { %1945 = vrcp.f32 %v1212_v45 }
 0x641   :  { %1947 = vrcp.f32 %v1219_v47 }
 0x64a   :  { %v1946_v49 = vpop.eup %1945 }
 0x64b   :  { %v1223_v50 = vmul.f32 %v1946_v49, %v1222_v48  ;;  %v1948_v43 = vpop.eup %1947  ;;  %v2735_v49 = vld [vmem:[#allocation7_spill] sm:$0xff] }
 0x64c   :  { %v1226_v57 = vsub.f32 1.0, %v1948_v43  ;;  %v1228_v11 = vmul.f32 %v1948_v43, %v2565_v10 }
 0x64d   :  { %v1224_v51 = vadd.f32 %v1223_v50, %v2356_v4  ;;  %v1972_v4 = vld [vmem:[%s2718_s2] ss:$12 sps:$4 sm:$0xff]  }
 0x64f   :  { %1949 = vtanh.f32 %v1224_v51 }
 0x659   :  { %v1950_v58 = vpop.eup %1949 }
 0x65a   :  { %v1227_v7 = vmul.f32 %v1950_v58, %v1226_v57 }
 0x65c   :  { %v2615_v59 = vadd.f32 %v1228_v11, %v1227_v7 }
 0x65e   :  { %1544 = vst [vmem:[%s2721_s5 + $0x28] sm:$0xff] %v2615_v59  ;;  %v1238_v21 = vpack.c.bf16 %v2615_v59, %v2615_v59 }
 0x660   :  { %1272 = vmatmul.mubr.bf16.vlgmr.msra.gmra.mrb[40].mxu0 %v1238_v21  ;;  %1796 = vmatmul.mubr.bf16.vlgmr.msra.gmra.mrb[32].mxu1 %v1238_v21 }
 0x661   :  { %1352 = vmatpush1.bf16.msra.mxu0 %v1972_v4  ;;  %1800 = vmatpush3.bf16.msra.mxu1 %v1973_v53 }
 0x662   :  { %1353 = vmatprep.subr.bf16.mxu0 %v1974_v19  ;;  %1801 = vmatprep.subr.bf16.mxu1 %v2731_v6 }
 0x663   :  { %1383 = vmatprep.mubr.bf16.mxu0 %v2732_v16  ;;  %1815 = vmatprep.mubr.msk.bf16.mxu1 %vm1995_vm0, %v2731_v6  ;;  %v1978_v16 = vld [vmem:[%s2718_s2 + $0x30] ss:$12 sps:$4 sm:$0xff]  }
 0x665   :  { %1354 = vmatpush1.bf16.msra.mxu0 %v1975_v20  ;;  %1802 = vmatpush3.bf16.msra.mxu1 %v1976_v15 }
 0x666   :  { %1355 = vmatprep.subr.bf16.mxu0 %v1977_v14  ;;  %1803 = vmatprep.subr.bf16.mxu1 %v2731_v6 }
 0x669   :  { %1356 = vmatpush1.bf16.msra.mxu0 %v1978_v16  ;;  %1804 = vmatpush3.bf16.msra.mxu1 %v1979_v61 }
 0x66a   :  { %1357 = vmatprep.subr.bf16.mxu0 %v1980_v62  ;;  %1805 = vmatprep.subr.bf16.mxu1 %v2731_v6  ;;  %v2736_v62 = vld [vmem:[#allocation5_spill] sm:$0xff] }
 0x66d   :  { %1358 = vmatpush1.bf16.msra.mxu0 %v1981_v34  ;;  %1806 = vmatpush3.bf16.msra.mxu1 %v1982_v1 }
 0x66e   :  { %1359 = vmatprep.subr.bf16.mxu0 %v1983_v63  ;;  %1807 = vmatprep.subr.bf16.mxu1 %v2731_v6 }
 0x671   :  { %1360 = vmatpush1.bf16.msra.mxu0 %v1984_v25  ;;  %1808 = vmatpush3.bf16.msra.mxu1 %v1985_v55 }
 0x672   :  { %1361 = vmatprep.subr.bf16.mxu0 %v1986_v31  ;;  %1809 = vmatprep.subr.bf16.mxu1 %v2731_v6 }
 0x675   :  { %1362 = vmatpush1.bf16.msra.mxu0 %v1987_v18  ;;  %1810 = vmatpush3.bf16.msra.mxu1 %v1988_v24 }
 0x676   :  { %1363 = vmatprep.subr.bf16.mxu0 %v1989_v12  ;;  %1811 = vmatprep.subr.bf16.mxu1 %v2731_v6 }
 0x679   :  { %1364 = vmatpush1.bf16.msra.mxu0 %v1990_v2  ;;  %1812 = vmatpush3.bf16.msra.mxu1 %v2265_v52 }
 0x67a   :  { %1365 = vmatprep.subr.bf16.mxu0 %v1991_v37  ;;  %1813 = vmatprep.subr.bf16.mxu1 %v2731_v6 }
 0x67d   :  { %1366 = vmatpush1.bf16.msra.mxu0 %v1992_v23  ;;  %1814 = vmatpush3.bf16.msra.mxu1 %v2275_v54 }
 0x733   :  { %v1273_v5 = vpop.f32.mrb[40].mxu0  ;;  %v1314_v28 = vpop.f32.mrb[32].mxu1 }
 0x734   :  { %v1320_v0 = vadd.f32 %v1273_v5, %v2358_v9  ;;  %v1275_v8 = vpop.f32.mrb[41].mxu0  ;;  %v1797_v52 = vpop.f32.mrb[33].mxu1  ;;  %v1334_v33 = vadd.f32 %v1314_v28, %v2369_v60 }
 0x735   :  { %v1327_v56 = vadd.f32 %v1275_v8, %v2733_v13  ;;  %v1277_v17 = vpop.f32.mrb[42].mxu0  ;;  %v1317_v10 = vpop.f32.mrb[34].mxu1 }
 0x736   :  { %v1545_v3 = vmul.f32 -1.442695, %v1320_v0  ;;  %v1278_v26 = vpop.f32.mrb[43].mxu0  ;;  %v1798_v6 = vpop.f32.mrb[35].mxu1 }
 0x737   :  { %v1546_v27 = vmul.f32 -1.442695, %v1327_v56 }
 0x738   :  { %1951 = vpow2.f32 %v1545_v3 }
 0x739   :  { %1953 = vpow2.f32 %v1546_v27 }
 0x742   :  { %v1952_v29 = vpop.eup %1951 }
 0x743   :  { %v1324_v30 = vadd.f32 1.0, %v1952_v29  ;;  %v1954_v54 = vpop.eup %1953 }
 0x744   :  { %v1331_v32 = vadd.f32 1.0, %v1954_v54 }
 0x745   :  { %1955 = vrcp.f32 %v1324_v30 }
 0x746   :  { %1957 = vrcp.f32 %v1331_v32 }
 0x74f   :  { %v1956_v9 = vpop.eup %1955 }
 0x750   :  { %v1335_v35 = vmul.f32 %v1956_v9, %v1334_v33  ;;  %v1958_v39 = vpop.eup %1957 }
 0x751   :  { %v1338_v40 = vsub.f32 1.0, %v1958_v39  ;;  %v1340_v44 = vmul.f32 %v1958_v39, %v2615_v59 }
 0x752   :  { %v1336_v38 = vadd.f32 %v1335_v35, %v2734_v36 }
 0x754   :  { %1959 = vtanh.f32 %v1336_v38 }
 0x75e   :  { %v1960_v41 = vpop.eup %1959 }
 0x75f   :  { %v1339_v42 = vmul.f32 %v1960_v41, %v1338_v40 }
 0x761   :  { %v1341_v45 = vadd.f32 %v1340_v44, %v1339_v42 }
 0x763   :  { %1547 = vst [vmem:[%s2721_s5 + $0x30] sm:$0xff] %v1341_v45  ;;  %v1350_v46 = vpack.c.bf16 %v1341_v45, %v1341_v45 }
 0x765   :  { %1384 = vmatmul.mubr.bf16.vlgmr.msra.gmra.mrb[44].mxu0 %v1350_v46  ;;  %1816 = vmatmul.mubr.bf16.vlgmr.msra.gmra.mrb[36].mxu1 %v1350_v46 }
 0x838   :  { %v1385_v47 = vpop.f32.mrb[44].mxu0  ;;  %v1426_v48 = vpop.f32.mrb[36].mxu1 }
 0x839   :  { %v1432_v50 = vadd.f32 %v1385_v47, %v2735_v49  ;;  %v1387_v51 = vpop.f32.mrb[45].mxu0  ;;  %v1817_v43 = vpop.f32.mrb[37].mxu1  ;;  %v1446_v14 = vadd.f32 %v1426_v48, %v2369_v60 }
 0x83a   :  { %v1439_v57 = vadd.f32 %v1387_v51, %v2364_v22  ;;  %v1389_v58 = vpop.f32.mrb[46].mxu0  ;;  %v1429_v7 = vpop.f32.mrb[38].mxu1 }
 0x83b   :  { %v1548_v11 = vmul.f32 -1.442695, %v1432_v50  ;;  %v1390_v59 = vpop.f32.mrb[47].mxu0  ;;  %v1818_v21 = vpop.f32.mrb[39].mxu1 }
 0x83c   :  { %v1549_v4 = vmul.f32 -1.442695, %v1439_v57 }
 0x83d   :  { %1961 = vpow2.f32 %v1548_v11 }
 0x83e   :  { %1963 = vpow2.f32 %v1549_v4 }
 0x847   :  { %v1962_v53 = vpop.eup %1961 }
 0x848   :  { %v1436_v19 = vadd.f32 1.0, %v1962_v53  ;;  %v1964_v20 = vpop.eup %1963 }
 0x849   :  { %v1443_v15 = vadd.f32 1.0, %v1964_v20 }
 0x84a   :  { %1965 = vrcp.f32 %v1436_v19 }
 0x84b   :  { %1967 = vrcp.f32 %v1443_v15 }
 0x854   :  { %v1966_v16 = vpop.eup %1965 }
 0x855   :  { %v1447_v61 = vmul.f32 %v1966_v16, %v1446_v14  ;;  %v1968_v34 = vpop.eup %1967 }
 0x856   :  { %v1450_v1 = vsub.f32 1.0, %v1968_v34  ;;  %v1452_v55 = vmul.f32 %v1968_v34, %v1341_v45 }
 0x857   :  { %v1448_v22 = vadd.f32 %v1447_v61, %v2736_v62 }
 0x859   :  { %1969 = vtanh.f32 %v1448_v22 }
 0x863   :  { %v1970_v63 = vpop.eup %1969 }
 0x864   :  { %v1451_v25 = vmul.f32 %v1970_v63, %v1450_v1 }
 0x866   :  { %v1453_v31 = vadd.f32 %v1452_v55, %v1451_v25 }
 0x868   :  { %1550 = vst [vmem:[%s2721_s5 + $0x38] sm:$0xff] %v1453_v31  ;;  %1460 = vst [vmem:[%s2722_s6] sm:$0xff] %v1453_v31 }

</bundles_post_ra>
